<compile_context>
chip_gen: v7x
topology: tpu7x:2x2x1
jax: 0.10.0
libtpu: 0.0.40
codegen_flags: <defaults>
</compile_context>

<pallas_src>
import functools

import jax
import jax.numpy as jnp
from jax import lax
from jax.experimental import pallas as pl
from jax.experimental.pallas import tpu as pltpu  # noqa: F401  (TPU backend assumed)


# ----------------------------------------------------------------------------
# Fused kernel: last encoder layer + fc + log_softmax, whole batch in one step.
# Everything (weights + activations, a few KiB) is resident in VMEM.
# ----------------------------------------------------------------------------
def _encoder_fused_kernel(x_ref,
                          wqkv_ref, bqkv_ref,
                          wo_ref, bo_ref,
                          ln1_g_ref, ln1_b_ref,
                          w1_ref, b1_ref, w2_ref, b2_ref,
                          ln2_g_ref, ln2_b_ref,
                          wfc_ref, bfc_ref,
                          o_ref, *, B, S, D, nheads, dh):
    f32 = jnp.float32
    bf16 = jnp.bfloat16
    scale = 1.0 / (dh ** 0.5)

    # bf16 at the MXU boundary (MXUs are bf16-native on v5e/v6e/v7x), f32 acc.
    def mm(a, b):
        return jnp.dot(a.astype(bf16), b.astype(bf16), preferred_element_type=f32)

    x2 = x_ref[...]                                     # (B*S, D) f32

    # Hoist all small parameters once (JAX does not CSE broadcasts).
    bqkv = bqkv_ref[...]
    bo = bo_ref[...]
    g1, be1 = ln1_g_ref[...], ln1_b_ref[...]
    g2, be2 = ln2_g_ref[...], ln2_b_ref[...]
    b1, b2 = b1_ref[...], b2_ref[...]
    bfc = bfc_ref[...]
    wfc = wfc_ref[...]                                  # (S*D, nclass)

    def layer_norm(z, gamma, beta):
        mu = jnp.mean(z, axis=-1, keepdims=True)
        var = jnp.mean((z - mu) ** 2, axis=-1, keepdims=True)   # biased, like torch
        return (z - mu) * lax.rsqrt(var + 1e-5) * gamma + beta

    # ---- fused QKV projection: ONE (B*S, D) x (D, 3D) MXU matmul -------------
    qkv = mm(x2, wqkv_ref[...]) + bqkv                  # (B*S, 3D) f32
    qkv_b = qkv.astype(bf16)                            # cast once for all heads

    # ---- multi-head attention, batched over B per head ------------------------
    # concat_h(ctx_h) @ Wo == sum_h ctx_h @ Wo_h (Wo stored per-head).  Kept as a
    # per-head accumulation: a minor-dim concat of dh=8-lane blocks is an
    # unaligned lane concatenation (layout-shuffle / lowering risk), and batching
    # over B already cuts the per-head matmul count by Bx.
    attn = jnp.zeros((B * S, D), f32)
    for h in range(nheads):                             # static, nheads = 4
        c0 = h * dh
        qh = qkv_b[:, c0:c0 + dh].reshape(B, S, dh)                 # (B,S,dh)
        kh = qkv_b[:, D + c0:D + c0 + dh].reshape(B, S, dh)
        vh = qkv_b[:, 2 * D + c0:2 * D + c0 + dh].reshape(B, S, dh)

        # scores: 'bqd,bkd->bqk' on the MXU (no XLU transpose), batched over B
        sc = lax.dot_general(qh, kh, (((2,), (2,)), ((0,), (0,))),
                             preferred_element_type=f32) * scale    # (B,S,S)
        m = jnp.max(sc, axis=-1, keepdims=True)
        p = jnp.exp(sc - m)
        # exact reciprocal (parity with torch's exact divide)
        p = p * pl.reciprocal(jnp.sum(p, axis=-1, keepdims=True), approx=False)

        ctx = lax.dot_general(p.astype(bf16), vh, (((2,), (1,)), ((0,), (0,))),
                              preferred_element_type=f32)           # (B,S,dh)
        attn = attn + mm(ctx.reshape(B * S, dh), wo_ref[h])         # (B*S, D)
    attn = attn + bo

    # ---- residual + LN + FFN on the whole (B*S, D) slab (no batch loop) ------
    h1 = layer_norm(x2 + attn, g1, be1)                 # (B*S, D)
    ff = jnp.maximum(mm(h1, w1_ref[...]) + b1, 0.0)     # (B*S, Hf)  ReLU
    ff = mm(ff, w2_ref[...]) + b2                       # (B*S, D)
    h2 = layer_norm(h1 + ff, g2, be2)                   # (B*S, D)

    # ---- fc over the flattened (S*D) features --------------------------------
    #   logits[b] = bfc + sum_s h2[b, s, :] @ Wfc[s*D:(s+1)*D, :]
    # No in-kernel (B*S,D)->(B,S*D) reshape; S batched (B,D)@(D,nclass) matmuls.
    h2b = h2.reshape(B, S, D)                           # free leading-dim split
    logits = bfc                                        # (1, nclass) -> broadcasts
    for s in range(S):                                  # static, S = 8
        logits = logits + mm(h2b[:, s, :], wfc[s * D:(s + 1) * D, :])   # (B,ncls)

    # ---- log_softmax, single store --------------------------------------------
    m = jnp.max(logits, axis=-1, keepdims=True)
    z = logits - m
    lse = jnp.log(jnp.sum(jnp.exp(z), axis=-1, keepdims=True))
    o_ref[...] = z - lse                                # one masked (B, nclass) store


def encoder_forward(x, layers, fc_params):
    # Reference forward applies every layer to the ORIGINAL x and only keeps the
    # last layer's output, so layers[:-1] are dead compute: skipping them is
    # bit-identical to the PyTorch module.
    p = layers[-1]
    wfc, bfc = fc_params
    B, S, D = x.shape
    nheads = p['nheads']
    dh = D // nheads
    nclass = wfc.shape[1]

    kernel = functools.partial(_encoder_fused_kernel,
                               B=B, S=S, D=D, nheads=nheads, dh=dh)

    # Single fused pallas_call, single grid step; all operands whole in VMEM.
    # TODO(synk): at production sizes, tile the FFN (hidden) and fc (S*D) weight
    #             dims over a grid axis with explicit BlockSpecs, set
    #             pltpu.CompilerParams(vmem_limit_bytes=...) for v7x's 64 MiB
    #             VMEM (including 2x double-buffering per input), and add a
    #             leading "parallel" batch grid axis so both v7x TensorCores
    #             are used; unnecessary at these tiny shapes.
    return pl.pallas_call(
        kernel,
        out_shape=jax.ShapeDtypeStruct((B, nclass), jnp.float32),
    )(x.reshape(B * S, D),
      p['wqkv'], p['bqkv'], p['wo'], p['bo'],
      p['ln1_g'], p['ln1_b'],
      p['w1'], p['b1'], p['w2'], p['b2'],
      p['ln2_g'], p['ln2_b'],
      wfc, bfc)


# ----------------------------------------------------------------------------
# Parameter init (deterministic, mimics torch nn.Linear default uniform init).
# ----------------------------------------------------------------------------
def _linear_init(key, fan_in, fan_out):
    kw, kb = jax.random.split(key)
    bound = 1.0 / (fan_in ** 0.5)
    w = jax.random.uniform(kw, (fan_out, fan_in), jnp.float32, -bound, bound)  # (out,in)
    b = jax.random.uniform(kb, (fan_out,), jnp.float32, -bound, bound)
    return w, b


def init_encoder_params(key, nlayers, d, nheads, seq, hidden, nclass):
    dh = d // nheads
    inp = seq * d                       # the `input` arg of the PyTorch Encoder
    keys = jax.random.split(key, nlayers + 1)
    layers = []
    for l in range(nlayers):
        ks = jax.random.split(keys[l], 6)
        wq, bq = _linear_init(ks[0], d, d)
        wk, bk = _linear_init(ks[1], d, d)
        wv, bv = _linear_init(ks[2], d, d)
        wo, bo = _linear_init(ks[3], d, d)
        w1, b1 = _linear_init(ks[4], d, hidden)
        w2, b2 = _linear_init(ks[5], hidden, d)
        layers.append(dict(
            nheads=nheads,
            # (in, out) layouts; Q/K/V packed into one (D, 3D) weight + (1, 3D) bias
            wqkv=jnp.concatenate([wq.T, wk.T, wv.T], axis=1),
            bqkv=jnp.concatenate([bq, bk, bv]).reshape(1, 3 * d),
            wo=wo.T.reshape(nheads, dh, d),            # per-head row blocks of Wo^T
            bo=bo.reshape(1, d),
            ln1_g=jnp.ones((1, d), jnp.float32), ln1_b=jnp.zeros((1, d), jnp.float32),
            w1=w1.T, b1=b1.reshape(1, hidden),         # (D, Hf)
            w2=w2.T, b2=b2.reshape(1, d),              # (Hf, D)
            ln2_g=jnp.ones((1, d), jnp.float32), ln2_b=jnp.zeros((1, d), jnp.float32),
        ))
    wfc, bfc = _linear_init(keys[-1], inp, nclass)
    return layers, (wfc.T, bfc.reshape(1, nclass))     # (input, nclass)


if __name__ == "__main__":
    # Small, module-consistent shapes.
    nlayers, d, nheads, seq, hidden, nclass, batch = 2, 32, 4, 8, 64, 10, 2
    inp = seq * d                                      # `input` arg = 256

    key = jax.random.PRNGKey(0)
    k_param, k_x = jax.random.split(key)
    layers, fc_params = init_encoder_params(k_param, nlayers, d, nheads, seq, hidden, nclass)
    x = jax.random.normal(k_x, (batch, seq, d), dtype=jnp.float32)

    out = encoder_forward(x, layers, fc_params)
    out = jax.block_until_ready(out)

    assert out.shape == (batch, nclass)
    # rows of log_softmax must (log-)sum to ~0
    assert jnp.allclose(jnp.sum(jnp.exp(out), axis=1), 1.0, atol=1e-4)
    print("KERNEL_OK")
</pallas_src>

<mosaic_0001>
module attributes {stable_mosaic.version = 11 : i64} {
  func.func @_encoder_fused_kernel(%arg0: memref<16x32xf32, #tpu.memory_space<vmem>>, %arg1: memref<32x96xf32, #tpu.memory_space<vmem>>, %arg2: memref<1x96xf32, #tpu.memory_space<vmem>>, %arg3: memref<4x8x32xf32, #tpu.memory_space<vmem>>, %arg4: memref<1x32xf32, #tpu.memory_space<vmem>>, %arg5: memref<1x32xf32, #tpu.memory_space<vmem>>, %arg6: memref<1x32xf32, #tpu.memory_space<vmem>>, %arg7: memref<32x64xf32, #tpu.memory_space<vmem>>, %arg8: memref<1x64xf32, #tpu.memory_space<vmem>>, %arg9: memref<64x32xf32, #tpu.memory_space<vmem>>, %arg10: memref<1x32xf32, #tpu.memory_space<vmem>>, %arg11: memref<1x32xf32, #tpu.memory_space<vmem>>, %arg12: memref<1x32xf32, #tpu.memory_space<vmem>>, %arg13: memref<256x10xf32, #tpu.memory_space<vmem>>, %arg14: memref<1x10xf32, #tpu.memory_space<vmem>>, %arg15: memref<2x10xf32, #tpu.memory_space<vmem>>) attributes {dimension_semantics = [], scalar_prefetch = 0 : i64, scratch_operands = 0 : i64, tpu.core_type = #tpu.core_type<tc>} {
    %c0 = arith.constant 0 : index
    %c0_0 = arith.constant 0 : index
    %0 = vector.load %arg0[%c0, %c0_0] : memref<16x32xf32, #tpu.memory_space<vmem>>, vector<16x32xf32>
    %c0_1 = arith.constant 0 : index
    %c0_2 = arith.constant 0 : index
    %1 = vector.load %arg2[%c0_1, %c0_2] : memref<1x96xf32, #tpu.memory_space<vmem>>, vector<1x96xf32>
    %c0_3 = arith.constant 0 : index
    %c0_4 = arith.constant 0 : index
    %2 = vector.load %arg4[%c0_3, %c0_4] : memref<1x32xf32, #tpu.memory_space<vmem>>, vector<1x32xf32>
    %c0_5 = arith.constant 0 : index
    %c0_6 = arith.constant 0 : index
    %3 = vector.load %arg5[%c0_5, %c0_6] : memref<1x32xf32, #tpu.memory_space<vmem>>, vector<1x32xf32>
    %c0_7 = arith.constant 0 : index
    %c0_8 = arith.constant 0 : index
    %4 = vector.load %arg6[%c0_7, %c0_8] : memref<1x32xf32, #tpu.memory_space<vmem>>, vector<1x32xf32>
    %c0_9 = arith.constant 0 : index
    %c0_10 = arith.constant 0 : index
    %5 = vector.load %arg11[%c0_9, %c0_10] : memref<1x32xf32, #tpu.memory_space<vmem>>, vector<1x32xf32>
    %c0_11 = arith.constant 0 : index
    %c0_12 = arith.constant 0 : index
    %6 = vector.load %arg12[%c0_11, %c0_12] : memref<1x32xf32, #tpu.memory_space<vmem>>, vector<1x32xf32>
    %c0_13 = arith.constant 0 : index
    %c0_14 = arith.constant 0 : index
    %7 = vector.load %arg8[%c0_13, %c0_14] : memref<1x64xf32, #tpu.memory_space<vmem>>, vector<1x64xf32>
    %c0_15 = arith.constant 0 : index
    %c0_16 = arith.constant 0 : index
    %8 = vector.load %arg10[%c0_15, %c0_16] : memref<1x32xf32, #tpu.memory_space<vmem>>, vector<1x32xf32>
    %c0_17 = arith.constant 0 : index
    %c0_18 = arith.constant 0 : index
    %9 = vector.load %arg14[%c0_17, %c0_18] : memref<1x10xf32, #tpu.memory_space<vmem>>, vector<1x10xf32>
    %c0_19 = arith.constant 0 : index
    %c0_20 = arith.constant 0 : index
    %10 = vector.load %arg13[%c0_19, %c0_20] : memref<256x10xf32, #tpu.memory_space<vmem>>, vector<256x10xf32>
    %c0_21 = arith.constant 0 : index
    %c0_22 = arith.constant 0 : index
    %11 = vector.load %arg1[%c0_21, %c0_22] : memref<32x96xf32, #tpu.memory_space<vmem>>, vector<32x96xf32>
    %12 = arith.truncf %0 : vector<16x32xf32> to vector<16x32xbf16>
    %13 = arith.truncf %11 : vector<32x96xf32> to vector<32x96xbf16>
    %cst = arith.constant dense<0.000000e+00> : vector<16x96xf32>
    %14 = tpu.matmul %12, %13, %cst {dimension_numbers = #tpu.dot_dimension_numbers<[1], [0], [0], [1], [0, 0, 1, 1], [], []>} : vector<16x32xbf16>, vector<32x96xbf16>, vector<16x96xf32> -> vector<16x96xf32>
    %15 = vector.broadcast %1 : vector<1x96xf32> to vector<16x96xf32>
    %16 = arith.addf %14, %15 : vector<16x96xf32>
    %17 = arith.truncf %16 : vector<16x96xf32> to vector<16x96xbf16>
    %cst_23 = arith.constant 0.000000e+00 : f32
    %18 = vector.broadcast %cst_23 : f32 to vector<16x32xf32>
    %19 = vector.extract_strided_slice %17 {offsets = [0, 0], sizes = [16, 8], strides = [1, 1]} : vector<16x96xbf16> to vector<16x8xbf16>
    %20 = vector.shape_cast %19 : vector<16x8xbf16> to vector<2x8x8xbf16>
    %21 = vector.extract_strided_slice %17 {offsets = [0, 32], sizes = [16, 8], strides = [1, 1]} : vector<16x96xbf16> to vector<16x8xbf16>
    %22 = vector.shape_cast %21 : vector<16x8xbf16> to vector<2x8x8xbf16>
    %23 = vector.extract_strided_slice %17 {offsets = [0, 64], sizes = [16, 8], strides = [1, 1]} : vector<16x96xbf16> to vector<16x8xbf16>
    %24 = vector.shape_cast %23 : vector<16x8xbf16> to vector<2x8x8xbf16>
    %cst_24 = arith.constant dense<0.000000e+00> : vector<2x8x8xf32>
    %25 = tpu.matmul %20, %22, %cst_24 {dimension_numbers = #tpu.dot_dimension_numbers<[2], [2], [1], [1], [0, 0, 0, 1, 1, 1], [0], [0]>} : vector<2x8x8xbf16>, vector<2x8x8xbf16>, vector<2x8x8xf32> -> vector<2x8x8xf32>
    %cst_25 = arith.constant 0.353553385 : f32
    %26 = vector.broadcast %cst_25 : f32 to vector<2x8x8xf32>
    %27 = arith.mulf %25, %26 : vector<2x8x8xf32>
    %cst_26 = arith.constant dense<0xFF800000> : vector<2x8xf32>
    %28 = vector.multi_reduction <maximumf>, %27, %cst_26 [2] : vector<2x8x8xf32> to vector<2x8xf32>
    %29 = vector.shape_cast %28 : vector<2x8xf32> to vector<2x8x1xf32>
    %30 = vector.broadcast %29 : vector<2x8x1xf32> to vector<2x8x8xf32>
    %31 = arith.subf %27, %30 : vector<2x8x8xf32>
    %32 = math.exp %31 : vector<2x8x8xf32>
    %cst_27 = arith.constant dense<0.000000e+00> : vector<2x8xf32>
    %33 = vector.multi_reduction <add>, %32, %cst_27 [2] : vector<2x8x8xf32> to vector<2x8xf32>
    %34 = vector.shape_cast %33 : vector<2x8xf32> to vector<2x8x1xf32>
    %35 = tpu.reciprocal %34 : vector<2x8x1xf32> -> vector<2x8x1xf32>
    %36 = vector.broadcast %35 : vector<2x8x1xf32> to vector<2x8x8xf32>
    %37 = arith.mulf %32, %36 : vector<2x8x8xf32>
    %38 = arith.truncf %37 : vector<2x8x8xf32> to vector<2x8x8xbf16>
    %cst_28 = arith.constant dense<0.000000e+00> : vector<2x8x8xf32>
    %39 = tpu.matmul %38, %24, %cst_28 {dimension_numbers = #tpu.dot_dimension_numbers<[2], [1], [1], [2], [0, 0, 0, 1, 1, 2], [0], [0]>} : vector<2x8x8xbf16>, vector<2x8x8xbf16>, vector<2x8x8xf32> -> vector<2x8x8xf32>
    %40 = vector.shape_cast %39 : vector<2x8x8xf32> to vector<16x8xf32>
    %c0_29 = arith.constant 0 : index
    %c0_30 = arith.constant 0 : index
    %c0_31 = arith.constant 0 : index
    %41 = vector.load %arg3[%c0_29, %c0_30, %c0_31] : memref<4x8x32xf32, #tpu.memory_space<vmem>>, vector<1x8x32xf32>
    %42 = vector.shape_cast %41 : vector<1x8x32xf32> to vector<8x32xf32>
    %43 = arith.truncf %40 : vector<16x8xf32> to vector<16x8xbf16>
    %44 = arith.truncf %42 : vector<8x32xf32> to vector<8x32xbf16>
    %cst_32 = arith.constant dense<0.000000e+00> : vector<16x32xf32>
    %45 = tpu.matmul %43, %44, %cst_32 {dimension_numbers = #tpu.dot_dimension_numbers<[1], [0], [0], [1], [0, 0, 1, 1], [], []>} : vector<16x8xbf16>, vector<8x32xbf16>, vector<16x32xf32> -> vector<16x32xf32>
    %46 = arith.addf %18, %45 : vector<16x32xf32>
    %47 = vector.extract_strided_slice %17 {offsets = [0, 8], sizes = [16, 8], strides = [1, 1]} : vector<16x96xbf16> to vector<16x8xbf16>
    %48 = vector.shape_cast %47 : vector<16x8xbf16> to vector<2x8x8xbf16>
    %49 = vector.extract_strided_slice %17 {offsets = [0, 40], sizes = [16, 8], strides = [1, 1]} : vector<16x96xbf16> to vector<16x8xbf16>
    %50 = vector.shape_cast %49 : vector<16x8xbf16> to vector<2x8x8xbf16>
    %51 = vector.extract_strided_slice %17 {offsets = [0, 72], sizes = [16, 8], strides = [1, 1]} : vector<16x96xbf16> to vector<16x8xbf16>
    %52 = vector.shape_cast %51 : vector<16x8xbf16> to vector<2x8x8xbf16>
    %cst_33 = arith.constant dense<0.000000e+00> : vector<2x8x8xf32>
    %53 = tpu.matmul %48, %50, %cst_33 {dimension_numbers = #tpu.dot_dimension_numbers<[2], [2], [1], [1], [0, 0, 0, 1, 1, 1], [0], [0]>} : vector<2x8x8xbf16>, vector<2x8x8xbf16>, vector<2x8x8xf32> -> vector<2x8x8xf32>
    %cst_34 = arith.constant 0.353553385 : f32
    %54 = vector.broadcast %cst_34 : f32 to vector<2x8x8xf32>
    %55 = arith.mulf %53, %54 : vector<2x8x8xf32>
    %cst_35 = arith.constant dense<0xFF800000> : vector<2x8xf32>
    %56 = vector.multi_reduction <maximumf>, %55, %cst_35 [2] : vector<2x8x8xf32> to vector<2x8xf32>
    %57 = vector.shape_cast %56 : vector<2x8xf32> to vector<2x8x1xf32>
    %58 = vector.broadcast %57 : vector<2x8x1xf32> to vector<2x8x8xf32>
    %59 = arith.subf %55, %58 : vector<2x8x8xf32>
    %60 = math.exp %59 : vector<2x8x8xf32>
    %cst_36 = arith.constant dense<0.000000e+00> : vector<2x8xf32>
    %61 = vector.multi_reduction <add>, %60, %cst_36 [2] : vector<2x8x8xf32> to vector<2x8xf32>
    %62 = vector.shape_cast %61 : vector<2x8xf32> to vector<2x8x1xf32>
    %63 = tpu.reciprocal %62 : vector<2x8x1xf32> -> vector<2x8x1xf32>
    %64 = vector.broadcast %63 : vector<2x8x1xf32> to vector<2x8x8xf32>
    %65 = arith.mulf %60, %64 : vector<2x8x8xf32>
    %66 = arith.truncf %65 : vector<2x8x8xf32> to vector<2x8x8xbf16>
    %cst_37 = arith.constant dense<0.000000e+00> : vector<2x8x8xf32>
    %67 = tpu.matmul %66, %52, %cst_37 {dimension_numbers = #tpu.dot_dimension_numbers<[2], [1], [1], [2], [0, 0, 0, 1, 1, 2], [0], [0]>} : vector<2x8x8xbf16>, vector<2x8x8xbf16>, vector<2x8x8xf32> -> vector<2x8x8xf32>
    %68 = vector.shape_cast %67 : vector<2x8x8xf32> to vector<16x8xf32>
    %c1 = arith.constant 1 : index
    %c0_38 = arith.constant 0 : index
    %c0_39 = arith.constant 0 : index
    %69 = vector.load %arg3[%c1, %c0_38, %c0_39] : memref<4x8x32xf32, #tpu.memory_space<vmem>>, vector<1x8x32xf32>
    %70 = vector.shape_cast %69 : vector<1x8x32xf32> to vector<8x32xf32>
    %71 = arith.truncf %68 : vector<16x8xf32> to vector<16x8xbf16>
    %72 = arith.truncf %70 : vector<8x32xf32> to vector<8x32xbf16>
    %cst_40 = arith.constant dense<0.000000e+00> : vector<16x32xf32>
    %73 = tpu.matmul %71, %72, %cst_40 {dimension_numbers = #tpu.dot_dimension_numbers<[1], [0], [0], [1], [0, 0, 1, 1], [], []>} : vector<16x8xbf16>, vector<8x32xbf16>, vector<16x32xf32> -> vector<16x32xf32>
    %74 = arith.addf %46, %73 : vector<16x32xf32>
    %75 = vector.extract_strided_slice %17 {offsets = [0, 16], sizes = [16, 8], strides = [1, 1]} : vector<16x96xbf16> to vector<16x8xbf16>
    %76 = vector.shape_cast %75 : vector<16x8xbf16> to vector<2x8x8xbf16>
    %77 = vector.extract_strided_slice %17 {offsets = [0, 48], sizes = [16, 8], strides = [1, 1]} : vector<16x96xbf16> to vector<16x8xbf16>
    %78 = vector.shape_cast %77 : vector<16x8xbf16> to vector<2x8x8xbf16>
    %79 = vector.extract_strided_slice %17 {offsets = [0, 80], sizes = [16, 8], strides = [1, 1]} : vector<16x96xbf16> to vector<16x8xbf16>
    %80 = vector.shape_cast %79 : vector<16x8xbf16> to vector<2x8x8xbf16>
    %cst_41 = arith.constant dense<0.000000e+00> : vector<2x8x8xf32>
    %81 = tpu.matmul %76, %78, %cst_41 {dimension_numbers = #tpu.dot_dimension_numbers<[2], [2], [1], [1], [0, 0, 0, 1, 1, 1], [0], [0]>} : vector<2x8x8xbf16>, vector<2x8x8xbf16>, vector<2x8x8xf32> -> vector<2x8x8xf32>
    %cst_42 = arith.constant 0.353553385 : f32
    %82 = vector.broadcast %cst_42 : f32 to vector<2x8x8xf32>
    %83 = arith.mulf %81, %82 : vector<2x8x8xf32>
    %cst_43 = arith.constant dense<0xFF800000> : vector<2x8xf32>
    %84 = vector.multi_reduction <maximumf>, %83, %cst_43 [2] : vector<2x8x8xf32> to vector<2x8xf32>
    %85 = vector.shape_cast %84 : vector<2x8xf32> to vector<2x8x1xf32>
    %86 = vector.broadcast %85 : vector<2x8x1xf32> to vector<2x8x8xf32>
    %87 = arith.subf %83, %86 : vector<2x8x8xf32>
    %88 = math.exp %87 : vector<2x8x8xf32>
    %cst_44 = arith.constant dense<0.000000e+00> : vector<2x8xf32>
    %89 = vector.multi_reduction <add>, %88, %cst_44 [2] : vector<2x8x8xf32> to vector<2x8xf32>
    %90 = vector.shape_cast %89 : vector<2x8xf32> to vector<2x8x1xf32>
    %91 = tpu.reciprocal %90 : vector<2x8x1xf32> -> vector<2x8x1xf32>
    %92 = vector.broadcast %91 : vector<2x8x1xf32> to vector<2x8x8xf32>
    %93 = arith.mulf %88, %92 : vector<2x8x8xf32>
    %94 = arith.truncf %93 : vector<2x8x8xf32> to vector<2x8x8xbf16>
    %cst_45 = arith.constant dense<0.000000e+00> : vector<2x8x8xf32>
    %95 = tpu.matmul %94, %80, %cst_45 {dimension_numbers = #tpu.dot_dimension_numbers<[2], [1], [1], [2], [0, 0, 0, 1, 1, 2], [0], [0]>} : vector<2x8x8xbf16>, vector<2x8x8xbf16>, vector<2x8x8xf32> -> vector<2x8x8xf32>
    %96 = vector.shape_cast %95 : vector<2x8x8xf32> to vector<16x8xf32>
    %c2 = arith.constant 2 : index
    %c0_46 = arith.constant 0 : index
    %c0_47 = arith.constant 0 : index
    %97 = vector.load %arg3[%c2, %c0_46, %c0_47] : memref<4x8x32xf32, #tpu.memory_space<vmem>>, vector<1x8x32xf32>
    %98 = vector.shape_cast %97 : vector<1x8x32xf32> to vector<8x32xf32>
    %99 = arith.truncf %96 : vector<16x8xf32> to vector<16x8xbf16>
    %100 = arith.truncf %98 : vector<8x32xf32> to vector<8x32xbf16>
    %cst_48 = arith.constant dense<0.000000e+00> : vector<16x32xf32>
    %101 = tpu.matmul %99, %100, %cst_48 {dimension_numbers = #tpu.dot_dimension_numbers<[1], [0], [0], [1], [0, 0, 1, 1], [], []>} : vector<16x8xbf16>, vector<8x32xbf16>, vector<16x32xf32> -> vector<16x32xf32>
    %102 = arith.addf %74, %101 : vector<16x32xf32>
    %103 = vector.extract_strided_slice %17 {offsets = [0, 24], sizes = [16, 8], strides = [1, 1]} : vector<16x96xbf16> to vector<16x8xbf16>
    %104 = vector.shape_cast %103 : vector<16x8xbf16> to vector<2x8x8xbf16>
    %105 = vector.extract_strided_slice %17 {offsets = [0, 56], sizes = [16, 8], strides = [1, 1]} : vector<16x96xbf16> to vector<16x8xbf16>
    %106 = vector.shape_cast %105 : vector<16x8xbf16> to vector<2x8x8xbf16>
    %107 = vector.extract_strided_slice %17 {offsets = [0, 88], sizes = [16, 8], strides = [1, 1]} : vector<16x96xbf16> to vector<16x8xbf16>
    %108 = vector.shape_cast %107 : vector<16x8xbf16> to vector<2x8x8xbf16>
    %cst_49 = arith.constant dense<0.000000e+00> : vector<2x8x8xf32>
    %109 = tpu.matmul %104, %106, %cst_49 {dimension_numbers = #tpu.dot_dimension_numbers<[2], [2], [1], [1], [0, 0, 0, 1, 1, 1], [0], [0]>} : vector<2x8x8xbf16>, vector<2x8x8xbf16>, vector<2x8x8xf32> -> vector<2x8x8xf32>
    %cst_50 = arith.constant 0.353553385 : f32
    %110 = vector.broadcast %cst_50 : f32 to vector<2x8x8xf32>
    %111 = arith.mulf %109, %110 : vector<2x8x8xf32>
    %cst_51 = arith.constant dense<0xFF800000> : vector<2x8xf32>
    %112 = vector.multi_reduction <maximumf>, %111, %cst_51 [2] : vector<2x8x8xf32> to vector<2x8xf32>
    %113 = vector.shape_cast %112 : vector<2x8xf32> to vector<2x8x1xf32>
    %114 = vector.broadcast %113 : vector<2x8x1xf32> to vector<2x8x8xf32>
    %115 = arith.subf %111, %114 : vector<2x8x8xf32>
    %116 = math.exp %115 : vector<2x8x8xf32>
    %cst_52 = arith.constant dense<0.000000e+00> : vector<2x8xf32>
    %117 = vector.multi_reduction <add>, %116, %cst_52 [2] : vector<2x8x8xf32> to vector<2x8xf32>
    %118 = vector.shape_cast %117 : vector<2x8xf32> to vector<2x8x1xf32>
    %119 = tpu.reciprocal %118 : vector<2x8x1xf32> -> vector<2x8x1xf32>
    %120 = vector.broadcast %119 : vector<2x8x1xf32> to vector<2x8x8xf32>
    %121 = arith.mulf %116, %120 : vector<2x8x8xf32>
    %122 = arith.truncf %121 : vector<2x8x8xf32> to vector<2x8x8xbf16>
    %cst_53 = arith.constant dense<0.000000e+00> : vector<2x8x8xf32>
    %123 = tpu.matmul %122, %108, %cst_53 {dimension_numbers = #tpu.dot_dimension_numbers<[2], [1], [1], [2], [0, 0, 0, 1, 1, 2], [0], [0]>} : vector<2x8x8xbf16>, vector<2x8x8xbf16>, vector<2x8x8xf32> -> vector<2x8x8xf32>
    %124 = vector.shape_cast %123 : vector<2x8x8xf32> to vector<16x8xf32>
    %c3 = arith.constant 3 : index
    %c0_54 = arith.constant 0 : index
    %c0_55 = arith.constant 0 : index
    %125 = vector.load %arg3[%c3, %c0_54, %c0_55] : memref<4x8x32xf32, #tpu.memory_space<vmem>>, vector<1x8x32xf32>
    %126 = vector.shape_cast %125 : vector<1x8x32xf32> to vector<8x32xf32>
    %127 = arith.truncf %124 : vector<16x8xf32> to vector<16x8xbf16>
    %128 = arith.truncf %126 : vector<8x32xf32> to vector<8x32xbf16>
    %cst_56 = arith.constant dense<0.000000e+00> : vector<16x32xf32>
    %129 = tpu.matmul %127, %128, %cst_56 {dimension_numbers = #tpu.dot_dimension_numbers<[1], [0], [0], [1], [0, 0, 1, 1], [], []>} : vector<16x8xbf16>, vector<8x32xbf16>, vector<16x32xf32> -> vector<16x32xf32>
    %130 = arith.addf %102, %129 : vector<16x32xf32>
    %131 = vector.broadcast %2 : vector<1x32xf32> to vector<16x32xf32>
    %132 = arith.addf %130, %131 : vector<16x32xf32>
    %133 = arith.addf %0, %132 : vector<16x32xf32>
    %cst_57 = arith.constant dense<0.000000e+00> : vector<16xf32>
    %134 = vector.multi_reduction <add>, %133, %cst_57 [1] : vector<16x32xf32> to vector<16xf32>
    %135 = vector.shape_cast %134 : vector<16xf32> to vector<16x1xf32>
    %cst_58 = arith.constant 3.200000e+01 : f32
    %136 = vector.broadcast %cst_58 : f32 to vector<16x1xf32>
    %137 = arith.divf %135, %136 : vector<16x1xf32>
    %138 = vector.broadcast %137 : vector<16x1xf32> to vector<16x32xf32>
    %139 = arith.subf %133, %138 : vector<16x32xf32>
    %140 = arith.mulf %139, %139 : vector<16x32xf32>
    %cst_59 = arith.constant dense<0.000000e+00> : vector<16xf32>
    %141 = vector.multi_reduction <add>, %140, %cst_59 [1] : vector<16x32xf32> to vector<16xf32>
    %142 = vector.shape_cast %141 : vector<16xf32> to vector<16x1xf32>
    %cst_60 = arith.constant 3.200000e+01 : f32
    %143 = vector.broadcast %cst_60 : f32 to vector<16x1xf32>
    %144 = arith.divf %142, %143 : vector<16x1xf32>
    %145 = vector.broadcast %137 : vector<16x1xf32> to vector<16x32xf32>
    %146 = arith.subf %133, %145 : vector<16x32xf32>
    %cst_61 = arith.constant 9.99999974E-6 : f32
    %147 = vector.broadcast %cst_61 : f32 to vector<16x1xf32>
    %148 = arith.addf %144, %147 : vector<16x1xf32>
    %149 = math.rsqrt %148 : vector<16x1xf32>
    %150 = vector.broadcast %149 : vector<16x1xf32> to vector<16x32xf32>
    %151 = arith.mulf %146, %150 : vector<16x32xf32>
    %152 = vector.broadcast %3 : vector<1x32xf32> to vector<16x32xf32>
    %153 = arith.mulf %151, %152 : vector<16x32xf32>
    %154 = vector.broadcast %4 : vector<1x32xf32> to vector<16x32xf32>
    %155 = arith.addf %153, %154 : vector<16x32xf32>
    %c0_62 = arith.constant 0 : index
    %c0_63 = arith.constant 0 : index
    %156 = vector.load %arg7[%c0_62, %c0_63] : memref<32x64xf32, #tpu.memory_space<vmem>>, vector<32x64xf32>
    %157 = arith.truncf %155 : vector<16x32xf32> to vector<16x32xbf16>
    %158 = arith.truncf %156 : vector<32x64xf32> to vector<32x64xbf16>
    %cst_64 = arith.constant dense<0.000000e+00> : vector<16x64xf32>
    %159 = tpu.matmul %157, %158, %cst_64 {dimension_numbers = #tpu.dot_dimension_numbers<[1], [0], [0], [1], [0, 0, 1, 1], [], []>} : vector<16x32xbf16>, vector<32x64xbf16>, vector<16x64xf32> -> vector<16x64xf32>
    %160 = vector.broadcast %7 : vector<1x64xf32> to vector<16x64xf32>
    %161 = arith.addf %159, %160 : vector<16x64xf32>
    %cst_65 = arith.constant 0.000000e+00 : f32
    %162 = vector.broadcast %cst_65 : f32 to vector<16x64xf32>
    %163 = arith.maximumf %161, %162 : vector<16x64xf32>
    %c0_66 = arith.constant 0 : index
    %c0_67 = arith.constant 0 : index
    %164 = vector.load %arg9[%c0_66, %c0_67] : memref<64x32xf32, #tpu.memory_space<vmem>>, vector<64x32xf32>
    %165 = arith.truncf %163 : vector<16x64xf32> to vector<16x64xbf16>
    %166 = arith.truncf %164 : vector<64x32xf32> to vector<64x32xbf16>
    %cst_68 = arith.constant dense<0.000000e+00> : vector<16x32xf32>
    %167 = tpu.matmul %165, %166, %cst_68 {dimension_numbers = #tpu.dot_dimension_numbers<[1], [0], [0], [1], [0, 0, 1, 1], [], []>} : vector<16x64xbf16>, vector<64x32xbf16>, vector<16x32xf32> -> vector<16x32xf32>
    %168 = vector.broadcast %8 : vector<1x32xf32> to vector<16x32xf32>
    %169 = arith.addf %167, %168 : vector<16x32xf32>
    %170 = arith.addf %155, %169 : vector<16x32xf32>
    %cst_69 = arith.constant dense<0.000000e+00> : vector<16xf32>
    %171 = vector.multi_reduction <add>, %170, %cst_69 [1] : vector<16x32xf32> to vector<16xf32>
    %172 = vector.shape_cast %171 : vector<16xf32> to vector<16x1xf32>
    %cst_70 = arith.constant 3.200000e+01 : f32
    %173 = vector.broadcast %cst_70 : f32 to vector<16x1xf32>
    %174 = arith.divf %172, %173 : vector<16x1xf32>
    %175 = vector.broadcast %174 : vector<16x1xf32> to vector<16x32xf32>
    %176 = arith.subf %170, %175 : vector<16x32xf32>
    %177 = arith.mulf %176, %176 : vector<16x32xf32>
    %cst_71 = arith.constant dense<0.000000e+00> : vector<16xf32>
    %178 = vector.multi_reduction <add>, %177, %cst_71 [1] : vector<16x32xf32> to vector<16xf32>
    %179 = vector.shape_cast %178 : vector<16xf32> to vector<16x1xf32>
    %cst_72 = arith.constant 3.200000e+01 : f32
    %180 = vector.broadcast %cst_72 : f32 to vector<16x1xf32>
    %181 = arith.divf %179, %180 : vector<16x1xf32>
    %182 = vector.broadcast %174 : vector<16x1xf32> to vector<16x32xf32>
    %183 = arith.subf %170, %182 : vector<16x32xf32>
    %cst_73 = arith.constant 9.99999974E-6 : f32
    %184 = vector.broadcast %cst_73 : f32 to vector<16x1xf32>
    %185 = arith.addf %181, %184 : vector<16x1xf32>
    %186 = math.rsqrt %185 : vector<16x1xf32>
    %187 = vector.broadcast %186 : vector<16x1xf32> to vector<16x32xf32>
    %188 = arith.mulf %183, %187 : vector<16x32xf32>
    %189 = vector.broadcast %5 : vector<1x32xf32> to vector<16x32xf32>
    %190 = arith.mulf %188, %189 : vector<16x32xf32>
    %191 = vector.broadcast %6 : vector<1x32xf32> to vector<16x32xf32>
    %192 = arith.addf %190, %191 : vector<16x32xf32>
    %193 = vector.shape_cast %192 : vector<16x32xf32> to vector<2x8x32xf32>
    %194 = vector.extract_strided_slice %193 {offsets = [0, 0, 0], sizes = [2, 1, 32], strides = [1, 1, 1]} : vector<2x8x32xf32> to vector<2x1x32xf32>
    %195 = vector.shape_cast %194 : vector<2x1x32xf32> to vector<2x32xf32>
    %196 = vector.extract_strided_slice %10 {offsets = [0, 0], sizes = [32, 10], strides = [1, 1]} : vector<256x10xf32> to vector<32x10xf32>
    %197 = arith.truncf %195 : vector<2x32xf32> to vector<2x32xbf16>
    %198 = arith.truncf %196 : vector<32x10xf32> to vector<32x10xbf16>
    %cst_74 = arith.constant dense<0.000000e+00> : vector<2x10xf32>
    %199 = tpu.matmul %197, %198, %cst_74 {dimension_numbers = #tpu.dot_dimension_numbers<[1], [0], [0], [1], [0, 0, 1, 1], [], []>} : vector<2x32xbf16>, vector<32x10xbf16>, vector<2x10xf32> -> vector<2x10xf32>
    %200 = vector.broadcast %9 : vector<1x10xf32> to vector<2x10xf32>
    %201 = arith.addf %200, %199 : vector<2x10xf32>
    %202 = vector.extract_strided_slice %193 {offsets = [0, 1, 0], sizes = [2, 1, 32], strides = [1, 1, 1]} : vector<2x8x32xf32> to vector<2x1x32xf32>
    %203 = vector.shape_cast %202 : vector<2x1x32xf32> to vector<2x32xf32>
    %204 = vector.extract_strided_slice %10 {offsets = [32, 0], sizes = [32, 10], strides = [1, 1]} : vector<256x10xf32> to vector<32x10xf32>
    %205 = arith.truncf %203 : vector<2x32xf32> to vector<2x32xbf16>
    %206 = arith.truncf %204 : vector<32x10xf32> to vector<32x10xbf16>
    %cst_75 = arith.constant dense<0.000000e+00> : vector<2x10xf32>
    %207 = tpu.matmul %205, %206, %cst_75 {dimension_numbers = #tpu.dot_dimension_numbers<[1], [0], [0], [1], [0, 0, 1, 1], [], []>} : vector<2x32xbf16>, vector<32x10xbf16>, vector<2x10xf32> -> vector<2x10xf32>
    %208 = arith.addf %201, %207 : vector<2x10xf32>
    %209 = vector.extract_strided_slice %193 {offsets = [0, 2, 0], sizes = [2, 1, 32], strides = [1, 1, 1]} : vector<2x8x32xf32> to vector<2x1x32xf32>
    %210 = vector.shape_cast %209 : vector<2x1x32xf32> to vector<2x32xf32>
    %211 = vector.extract_strided_slice %10 {offsets = [64, 0], sizes = [32, 10], strides = [1, 1]} : vector<256x10xf32> to vector<32x10xf32>
    %212 = arith.truncf %210 : vector<2x32xf32> to vector<2x32xbf16>
    %213 = arith.truncf %211 : vector<32x10xf32> to vector<32x10xbf16>
    %cst_76 = arith.constant dense<0.000000e+00> : vector<2x10xf32>
    %214 = tpu.matmul %212, %213, %cst_76 {dimension_numbers = #tpu.dot_dimension_numbers<[1], [0], [0], [1], [0, 0, 1, 1], [], []>} : vector<2x32xbf16>, vector<32x10xbf16>, vector<2x10xf32> -> vector<2x10xf32>
    %215 = arith.addf %208, %214 : vector<2x10xf32>
    %216 = vector.extract_strided_slice %193 {offsets = [0, 3, 0], sizes = [2, 1, 32], strides = [1, 1, 1]} : vector<2x8x32xf32> to vector<2x1x32xf32>
    %217 = vector.shape_cast %216 : vector<2x1x32xf32> to vector<2x32xf32>
    %218 = vector.extract_strided_slice %10 {offsets = [96, 0], sizes = [32, 10], strides = [1, 1]} : vector<256x10xf32> to vector<32x10xf32>
    %219 = arith.truncf %217 : vector<2x32xf32> to vector<2x32xbf16>
    %220 = arith.truncf %218 : vector<32x10xf32> to vector<32x10xbf16>
    %cst_77 = arith.constant dense<0.000000e+00> : vector<2x10xf32>
    %221 = tpu.matmul %219, %220, %cst_77 {dimension_numbers = #tpu.dot_dimension_numbers<[1], [0], [0], [1], [0, 0, 1, 1], [], []>} : vector<2x32xbf16>, vector<32x10xbf16>, vector<2x10xf32> -> vector<2x10xf32>
    %222 = arith.addf %215, %221 : vector<2x10xf32>
    %223 = vector.extract_strided_slice %193 {offsets = [0, 4, 0], sizes = [2, 1, 32], strides = [1, 1, 1]} : vector<2x8x32xf32> to vector<2x1x32xf32>
    %224 = vector.shape_cast %223 : vector<2x1x32xf32> to vector<2x32xf32>
    %225 = vector.extract_strided_slice %10 {offsets = [128, 0], sizes = [32, 10], strides = [1, 1]} : vector<256x10xf32> to vector<32x10xf32>
    %226 = arith.truncf %224 : vector<2x32xf32> to vector<2x32xbf16>
    %227 = arith.truncf %225 : vector<32x10xf32> to vector<32x10xbf16>
    %cst_78 = arith.constant dense<0.000000e+00> : vector<2x10xf32>
    %228 = tpu.matmul %226, %227, %cst_78 {dimension_numbers = #tpu.dot_dimension_numbers<[1], [0], [0], [1], [0, 0, 1, 1], [], []>} : vector<2x32xbf16>, vector<32x10xbf16>, vector<2x10xf32> -> vector<2x10xf32>
    %229 = arith.addf %222, %228 : vector<2x10xf32>
    %230 = vector.extract_strided_slice %193 {offsets = [0, 5, 0], sizes = [2, 1, 32], strides = [1, 1, 1]} : vector<2x8x32xf32> to vector<2x1x32xf32>
    %231 = vector.shape_cast %230 : vector<2x1x32xf32> to vector<2x32xf32>
    %232 = vector.extract_strided_slice %10 {offsets = [160, 0], sizes = [32, 10], strides = [1, 1]} : vector<256x10xf32> to vector<32x10xf32>
    %233 = arith.truncf %231 : vector<2x32xf32> to vector<2x32xbf16>
    %234 = arith.truncf %232 : vector<32x10xf32> to vector<32x10xbf16>
    %cst_79 = arith.constant dense<0.000000e+00> : vector<2x10xf32>
    %235 = tpu.matmul %233, %234, %cst_79 {dimension_numbers = #tpu.dot_dimension_numbers<[1], [0], [0], [1], [0, 0, 1, 1], [], []>} : vector<2x32xbf16>, vector<32x10xbf16>, vector<2x10xf32> -> vector<2x10xf32>
    %236 = arith.addf %229, %235 : vector<2x10xf32>
    %237 = vector.extract_strided_slice %193 {offsets = [0, 6, 0], sizes = [2, 1, 32], strides = [1, 1, 1]} : vector<2x8x32xf32> to vector<2x1x32xf32>
    %238 = vector.shape_cast %237 : vector<2x1x32xf32> to vector<2x32xf32>
    %239 = vector.extract_strided_slice %10 {offsets = [192, 0], sizes = [32, 10], strides = [1, 1]} : vector<256x10xf32> to vector<32x10xf32>
    %240 = arith.truncf %238 : vector<2x32xf32> to vector<2x32xbf16>
    %241 = arith.truncf %239 : vector<32x10xf32> to vector<32x10xbf16>
    %cst_80 = arith.constant dense<0.000000e+00> : vector<2x10xf32>
    %242 = tpu.matmul %240, %241, %cst_80 {dimension_numbers = #tpu.dot_dimension_numbers<[1], [0], [0], [1], [0, 0, 1, 1], [], []>} : vector<2x32xbf16>, vector<32x10xbf16>, vector<2x10xf32> -> vector<2x10xf32>
    %243 = arith.addf %236, %242 : vector<2x10xf32>
    %244 = vector.extract_strided_slice %193 {offsets = [0, 7, 0], sizes = [2, 1, 32], strides = [1, 1, 1]} : vector<2x8x32xf32> to vector<2x1x32xf32>
    %245 = vector.shape_cast %244 : vector<2x1x32xf32> to vector<2x32xf32>
    %246 = vector.extract_strided_slice %10 {offsets = [224, 0], sizes = [32, 10], strides = [1, 1]} : vector<256x10xf32> to vector<32x10xf32>
    %247 = arith.truncf %245 : vector<2x32xf32> to vector<2x32xbf16>
    %248 = arith.truncf %246 : vector<32x10xf32> to vector<32x10xbf16>
    %cst_81 = arith.constant dense<0.000000e+00> : vector<2x10xf32>
    %249 = tpu.matmul %247, %248, %cst_81 {dimension_numbers = #tpu.dot_dimension_numbers<[1], [0], [0], [1], [0, 0, 1, 1], [], []>} : vector<2x32xbf16>, vector<32x10xbf16>, vector<2x10xf32> -> vector<2x10xf32>
    %250 = arith.addf %243, %249 : vector<2x10xf32>
    %cst_82 = arith.constant dense<0xFF800000> : vector<2xf32>
    %251 = vector.multi_reduction <maximumf>, %250, %cst_82 [1] : vector<2x10xf32> to vector<2xf32>
    %252 = vector.shape_cast %251 : vector<2xf32> to vector<2x1xf32>
    %253 = vector.broadcast %252 : vector<2x1xf32> to vector<2x10xf32>
    %254 = arith.subf %250, %253 : vector<2x10xf32>
    %255 = math.exp %254 : vector<2x10xf32>
    %cst_83 = arith.constant dense<0.000000e+00> : vector<2xf32>
    %256 = vector.multi_reduction <add>, %255, %cst_83 [1] : vector<2x10xf32> to vector<2xf32>
    %257 = vector.shape_cast %256 : vector<2xf32> to vector<2x1xf32>
    %258 = math.log %257 : vector<2x1xf32>
    %259 = vector.broadcast %258 : vector<2x1xf32> to vector<2x10xf32>
    %260 = arith.subf %254, %259 : vector<2x10xf32>
    %c0_84 = arith.constant 0 : index
    %c0_85 = arith.constant 0 : index
    %261 = vector.load %arg15[%c0_84, %c0_85] : memref<2x10xf32, #tpu.memory_space<vmem>>, vector<2x10xf32>
    tpu.vector_store %arg15[%c0_84, %c0_85], %260 {strides = array<i32>} : memref<2x10xf32, #tpu.memory_space<vmem>>, vector<2x10xf32>,
    return
  }
}

</mosaic_0001>

<bundles_post_ra>
// kernel: tpu_custom_call.1
= control target key start
LH: loop header
LB: loop body
LE: loop exit
PB: predicated region body
PF: predicated region fallthrough
CT: control target
= control target key end

     0   :  { %v2356_v3 = vmov 0.0   ;;  %vm2357_vm0 = vmmov 0   ;;  %s2928_s0 = inlined_call_operand.vmem [shape: f32[16,32], index: 0, kind: input, shape index: {}]   ;;  %s2929_s1 = inlined_call_operand.vmem [shape: f32[32,96], index: 1, kind: input, shape index: {}]   ;;  %s2930_s2 = inlined_call_operand.vmem [shape: f32[1,96], index: 2, kind: input, shape index: {}]   ;;  %s2931_s3 = inlined_call_operand.vmem [shape: f32[4,8,32], index: 3, kind: input, shape index: {}]   ;;  %s2932_s4 = inlined_call_operand.vmem [shape: f32[1,32], index: 4, kind: input, shape index: {}]   ;;  %s2933_s5 = inlined_call_operand.vmem [shape: f32[1,32], index: 5, kind: input, shape index: {}]   ;;  %s2934_s6 = inlined_call_operand.vmem [shape: f32[1,32], index: 6, kind: input, shape index: {}]   ;;  %s2935_s7 = inlined_call_operand.vmem [shape: f32[32,64], index: 7, kind: input, shape index: {}]   ;;  %s2936_s8 = inlined_call_operand.vmem [shape: f32[1,64], index: 8, kind: input, shape index: {}]   ;;  %s2937_s9 = inlined_call_operand.vmem [shape: f32[64,32], index: 9, kind: input, shape index: {}]   ;;  %s2938_s10 = inlined_call_operand.vmem [shape: f32[1,32], index: 10, kind: input, shape index: {}]   ;;  %s2939_s11 = inlined_call_operand.vmem [shape: f32[1,32], index: 11, kind: input, shape index: {}]   ;;  %s2940_s12 = inlined_call_operand.vmem [shape: f32[1,32], index: 12, kind: input, shape index: {}]   ;;  %s2941_s13 = inlined_call_operand.vmem [shape: f32[256,10], index: 13, kind: input, shape index: {}]   ;;  %s2942_s14 = inlined_call_operand.vmem [shape: f32[1,10], index: 14, kind: input, shape index: {}]   ;;  %s2943_s15 = inlined_call_operand.hbm [shape: f32[2,10], index: 15, kind: output, shape index: {}]  }
   0x1   :  { %v95_v0 = vld [vmem:[%s2929_s1] sm:$0xff]  ;;  %v96_v1 = vld [vmem:[%s2929_s1 + $0x8] sm:$0xff]  ;;  %v97_v2 = vld [vmem:[%s2929_s1 + $0x10] sm:$0xff]  ;;  %2033 = vmatprep.subr.bf16.mxu0 %v2356_v3  ;;  %2037 = vmatprep.mubr.msk.bf16.mxu0 %vm2357_vm0, %v2356_v3 }
   0x2   :  { %v100_v4 = vpack.c.bf16 %v96_v1, %v95_v0  ;;  %v98_v5 = vld [vmem:[%s2929_s1 + $0x18] sm:$0xff]  ;;  %2077 = vmatprep.subr.bf16.mxu1 %v2356_v3  ;;  %2079 = vmatprep.mubr.msk.bf16.mxu1 %vm2357_vm0, %v2356_v3 }
   0x3   :  { %20 = vsyncpa [#allocation3], 0  ;;  %v101_v6 = vpack.c.bf16 %v98_v5, %v97_v2  ;;  %v2471_v7 = vld [vmem:[%s2928_s0] sm:$0xff]  ;;  %v2476_v8 = vld [vmem:[%s2928_s0 + $0x8] sm:$0xff]  ;;  %vm108_vm1 = vcmask 261120   ;;  %s2358_s0 = smov 96  }
   0x4   :  { %2034 = vmatpush3.bf16.msra.mxu0 %v100_v4  ;;  %v99_v9 = vpack.c.bf16 %v2476_v8, %v2471_v7  ;;  %v1911_v10 = vld [vmem:[%s2930_s2] ss:$0 sm:$0xff]  ;;  %vm161_vm2 = vcmask 64512   ;;  %s2359_s2 = smov 64   ;;  %vm287_vm3 = vcmask 1043456   ;;  %s2360_s16 = smov 88  }
   0x5   :  { %2035 = vmatprep.subr.bf16.mxu0 %v2356_v3  ;;  %s2361_s17 = smov 120   ;;  %s2362_s18 = smov 56   ;;  %vm1383_vm4 = vcmask 523264   ;;  %vm1481_vm5 = vcmask 1041409   ;;  %vm1883_vm6 = vcmask 74752  }
   0x6   :  { %s2363_s19 = smov 112   ;;  %s2364_s20 = smov 80  }
   0x7   :  { %s2365_s25 = smov 48   ;;  %s2366_s26 = smov 72  }
   0x8   :  { %2036 = vmatpush3.bf16.msra.mxu0 %v101_v6  ;;  %s2367_s27 = smov 104   ;;  %s2368_s1 = smov 40  }
   0x9   :  { %2041 = vmatprep.subr.bf16.mxu0 %v2356_v3 }
   0xb   :  { %2038 = vmatmul.mubr.msk.bf16.vlgmr.msra.gmra.mrb[0].mxu0 %vm108_vm1, %v99_v9 }
   0xc   :  { %2043 = vmatprep.mubr.msk.bf16.mxu0 %vm2357_vm0, %v2356_v3 }
  0xde   :  { %v146_v11 = vpop.f32.mrb[0].mxu0 }
  0xdf   :  { %v147_v12 = vadd.f32 %v1911_v10, %v146_v11  ;;  %v2039_v13 = vpop.f32.mrb[1].mxu0 }
  0xe0   :  { %v149_v14 = vpop.f32.mrb[2].mxu0 }
  0xe1   :  { %v2488_v15 = vpack.c.bf16 %v147_v12, %v147_v12  ;;  %v150_v16 = vadd.f32 %v1911_v10, %v149_v14  ;;  %v2040_v17 = vpop.f32.mrb[3].mxu0 }
  0xe3   :  { %159 = vrot.lane.b32.xlu0 %v2488_v15, %s2358_s0  ;;  %v2491_v18 = vpack.c.bf16 %v150_v16, %v150_v16 }
  0xe7   :  { %208 = vrot.lane.b32.xlu0 %v2491_v18, %s2358_s0 }
 0x155   :  { %v160_v19 = vpop.permute.xlu0 %159 }
 0x156   :  { %v166_v20 = vsel %vm161_vm2, %v160_v19, 0 }
 0x157   :  { %2042 = vmatpush3.bf16.xpose.msra.mxu0 %v166_v20 }
 0x158   :  { %2047 = vmatprep.subr.bf16.mxu0 %v2356_v3 }
 0x159   :  { %v209_v21 = vpop.permute.xlu0 %208 }
 0x15a   :  { %v214_v22 = vsel %vm161_vm2, %v209_v21, 0 }
 0x15e   :  { %2044 = vmatmul.mubr.msk.bf16.vlgmr.msra.gmra.mrb[4].mxu0 %vm161_vm2, %v2488_v15 }
 0x15f   :  { %2048 = vmatpush3.bf16.xpose.msra.mxu0 %v214_v22  ;;  %2049 = vmatprep.mubr.msk.bf16.mxu0 %vm2357_vm0, %v2356_v3 }
 0x160   :  { %2053 = vmatprep.subr.bf16.mxu0 %v2356_v3 }
 0x166   :  { %2050 = vmatmul.mubr.msk.bf16.vlgmr.msra.gmra.mrb[8].mxu0 %vm161_vm2, %v2491_v18 }
 0x167   :  { %2055 = vmatprep.mubr.msk.bf16.mxu0 %vm2357_vm0, %v2356_v3 }
 0x231   :  { %v202_v23 = vpop.f32.mrb[4].mxu0 }
 0x232   :  { %v256_v24 = vmul.f32 0.35355338, %v202_v23  ;;  %v2045_v25 = vpop.f32.mrb[5].mxu0 }
 0x233   :  { %v205_v26 = vpop.f32.mrb[6].mxu0 }
 0x234   :  { %v2046_v27 = vpop.f32.mrb[7].mxu0  ;;  %v258_v28 = vsel %vm161_vm2, %v256_v24, -inf }
 0x235   :  { %259 = vmax.xlane.f32.xlu1 %v258_v28 }
 0x239   :  { %v250_v29 = vpop.f32.mrb[8].mxu0 }
 0x23a   :  { %v257_v30 = vmul.f32 0.35355338, %v250_v29  ;;  %v2051_v31 = vpop.f32.mrb[9].mxu0 }
 0x23b   :  { %v253_v32 = vpop.f32.mrb[10].mxu0 }
 0x23c   :  { %v2052_v33 = vpop.f32.mrb[11].mxu0  ;;  %v261_v34 = vsel %vm161_vm2, %v257_v30, -inf }
 0x23d   :  { %262 = vmax.xlane.f32.xlu1 %v261_v34 }
 0x24e   :  { %282 = vrot.lane.b32.xlu1 %v2488_v15, %s2359_s2 }
 0x252   :  { %331 = vrot.lane.b32.xlu1 %v2491_v18, %s2359_s2 }
 0x2c2   :  { %v260_v35 = vpop.xlane.xlu1 %259 }
 0x2c3   :  { %v264_v36 = vsub.f32 %v256_v24, %v260_v35 }
 0x2c5   :  { %v266_v37 = vmul.f32 1.442695, %v264_v36 }
 0x2c7   :  { %2288 = vpow2.f32 %v266_v37 }
 0x2ca   :  { %v263_v38 = vpop.xlane.xlu1 %262 }
 0x2cb   :  { %v265_v39 = vsub.f32 %v257_v30, %v263_v38 }
 0x2cd   :  { %v268_v40 = vmul.f32 1.442695, %v265_v39 }
 0x2ce   :  { %v283_v41 = vpop.permute.xlu1 %282 }
 0x2cf   :  { %2290 = vpow2.f32 %v268_v40  ;;  %v289_v42 = vsel %vm287_vm3, %v283_v41, 0 }
 0x2d0   :  { %2054 = vmatpush3.bf16.msra.mxu0 %v289_v42 }
 0x2d1   :  { %v2289_v43 = vpop.eup %2288  ;;  %2059 = vmatprep.subr.bf16.mxu0 %v2356_v3 }
 0x2d2   :  { %v270_v44 = vsel %vm161_vm2, %v2289_v43, 0.0  ;;  %v332_v48 = vpop.permute.xlu1 %331 }
 0x2d3   :  { %271 = vadd.xlane.f32.xlu0 %v270_v44  ;;  %v337_v53 = vsel %vm287_vm3, %v332_v48, 0  ;;  %v379_v44 = vld [vmem:[%s2931_s3] sm:$0xff] }
 0x2d9   :  { %v2291_v45 = vpop.eup %2290 }
 0x2da   :  { %v273_v46 = vsel %vm161_vm2, %v2291_v45, 0.0 }
 0x2db   :  { %274 = vadd.xlane.f32.xlu1 %v273_v46 }
 0x2e9   :  { %434 = vrot.lane.b32.xlu0 %v2491_v18, %s2360_s16 }
 0x2ec   :  { %384 = vrot.lane.b32.xlu1 %v2488_v15, %s2360_s16 }
 0x2f0   :  { %382 = vrot.lane.b32.xlu1 %v2488_v15, %s2361_s17 }
 0x2f4   :  { %432 = vrot.lane.b32.xlu1 %v2491_v18, %s2361_s17 }
 0x360   :  { %v272_v47 = vpop.xlane.xlu0 %271 }
 0x361   :  { %2292 = vrcp.f32 %v272_v47 }
 0x364   :  { %v435_v59 = vpop.permute.xlu0 %434 }
 0x365   :  { %v440_v61 = vsel %vm161_vm2, %v435_v59, 0 }
 0x368   :  { %v275_v49 = vpop.xlane.xlu1 %274 }
 0x369   :  { %2294 = vrcp.f32 %v275_v49 }
 0x36b   :  { %v2293_v50 = vpop.eup %2292 }
 0x36c   :  { %v278_v51 = vmul.f32 %v2293_v50, %v2289_v43  ;;  %v385_v56 = vpop.permute.xlu1 %384 }
 0x36d   :  { %v390_v58 = vsel %vm161_vm2, %v385_v56, 0 }
 0x36e   :  { %v280_v52 = vpack.c.bf16 %v278_v51, %v278_v51 }
 0x370   :  { %2056 = vmatmul.mubr.msk.bf16.vlgmr.msra.gmra.mrb[12].mxu0 %vm161_vm2, %v280_v52  ;;  %v383_v60 = vpop.permute.xlu1 %382 }
 0x371   :  { %2060 = vmatpush3.bf16.msra.mxu0 %v337_v53  ;;  %2061 = vmatprep.mubr.msk.bf16.mxu0 %vm2357_vm0, %v2356_v3 }
 0x372   :  { %2065 = vmatprep.subr.bf16.mxu0 %v2356_v3 }
 0x373   :  { %v2295_v54 = vpop.eup %2294 }
 0x374   :  { %v279_v55 = vmul.f32 %v2295_v54, %v2291_v45  ;;  %v433_v62 = vpop.permute.xlu1 %432  ;;  %v381_v45 = vpack.c.bf16 %v379_v44, %v379_v44  ;;  %v1923_v54 = vld [vmem:[%s2931_s3 + $0x8] sm:$0xff] }
 0x376   :  { %v281_v57 = vpack.c.bf16 %v279_v55, %v279_v55  ;;  %v659_v49 = vsel %vm287_vm3, %v381_v45, 0  ;;  %v607_v55 = vpack.c.bf16 %v1923_v54, %v1923_v54 }
 0x378   :  { %2062 = vmatmul.mubr.msk.bf16.vlgmr.msra.gmra.mrb[16].mxu0 %vm161_vm2, %v281_v57  ;;  %v612_v56 = vsel %vm287_vm3, %v607_v55, 0 }
 0x379   :  { %2067 = vmatprep.mubr.msk.bf16.mxu0 %vm2357_vm0, %v2356_v3 }
 0x37a   :  { %2066 = vmatpush3.bf16.xpose.msra.mxu0 %v390_v58 }
 0x37b   :  { %2071 = vmatprep.subr.bf16.mxu0 %v2356_v3 }
 0x381   :  { %2068 = vmatmul.mubr.msk.bf16.vlgmr.msra.gmra.mrb[20].mxu0 %vm161_vm2, %v383_v60 }
 0x382   :  { %2072 = vmatpush3.bf16.xpose.msra.mxu0 %v440_v61  ;;  %2073 = vmatprep.mubr.msk.bf16.mxu0 %vm2357_vm0, %v2356_v3 }
 0x383   :  { %2083 = vmatprep.subr.bf16.mxu0 %v2356_v3 }
 0x389   :  { %2074 = vmatmul.mubr.msk.bf16.vlgmr.msra.gmra.mrb[24].mxu0 %vm161_vm2, %v433_v62 }
 0x38a   :  { %2085 = vmatprep.mubr.msk.bf16.mxu0 %vm2357_vm0, %v2356_v3 }
 0x443   :  { %v2536_v63 = vpop.f32.mrb[12].mxu0 }
 0x444   :  { %v2057_v0 = vpop.f32.mrb[13].mxu0 }
 0x445   :  { %v328_v1 = vpop.f32.mrb[14].mxu0 }
 0x446   :  { %v2058_v2 = vpop.f32.mrb[15].mxu0 }
 0x44b   :  { %v2538_v4 = vpop.f32.mrb[16].mxu0 }
 0x44c   :  { %v380_v5 = vpack.c.bf16 %v2538_v4, %v2536_v63  ;;  %v2063_v6 = vpop.f32.mrb[17].mxu0 }
 0x44d   :  { %v376_v9 = vpop.f32.mrb[18].mxu0 }
 0x44e   :  { %v2064_v10 = vpop.f32.mrb[19].mxu0 }
 0x454   :  { %v426_v11 = vpop.f32.mrb[20].mxu0 }
 0x455   :  { %v482_v12 = vmul.f32 0.35355338, %v426_v11  ;;  %v2069_v13 = vpop.f32.mrb[21].mxu0 }
 0x456   :  { %v429_v14 = vpop.f32.mrb[22].mxu0 }
 0x457   :  { %v2070_v16 = vpop.f32.mrb[23].mxu0  ;;  %v484_v17 = vsel %vm161_vm2, %v482_v12, -inf }
 0x458   :  { %485 = vmax.xlane.f32.xlu1 %v484_v17 }
 0x45c   :  { %v476_v19 = vpop.f32.mrb[24].mxu0 }
 0x45d   :  { %v483_v20 = vmul.f32 0.35355338, %v476_v19  ;;  %v2075_v21 = vpop.f32.mrb[25].mxu0 }
 0x45e   :  { %v479_v22 = vpop.f32.mrb[26].mxu0 }
 0x45f   :  { %v2076_v23 = vpop.f32.mrb[27].mxu0  ;;  %v487_v24 = vsel %vm161_vm2, %v483_v20, -inf }
 0x460   :  { %488 = vmax.xlane.f32.xlu0 %v487_v24 }
 0x476   :  { %556 = vrot.lane.b32.xlu0 %v2491_v18, %s2362_s18 }
 0x47a   :  { %702 = vrot.lane.b32.xlu0 %v2488_v15, %s2363_s19 }
 0x4e5   :  { %v486_v25 = vpop.xlane.xlu1 %485 }
 0x4e6   :  { %v490_v26 = vsub.f32 %v482_v12, %v486_v25 }
 0x4e8   :  { %v492_v27 = vmul.f32 1.442695, %v490_v26 }
 0x4ea   :  { %2296 = vpow2.f32 %v492_v27 }
 0x4ed   :  { %v489_v28 = vpop.xlane.xlu0 %488 }
 0x4ee   :  { %v491_v29 = vsub.f32 %v483_v20, %v489_v28 }
 0x4f0   :  { %v494_v30 = vmul.f32 1.442695, %v491_v29 }
 0x4f1   :  { %v557_v31 = vpop.permute.xlu0 %556 }
 0x4f2   :  { %2298 = vpow2.f32 %v494_v30  ;;  %v562_v32 = vsel %vm287_vm3, %v557_v31, 0 }
 0x4f3   :  { %2084 = vmatpush3.bf16.msra.mxu0 %v562_v32 }
 0x4f4   :  { %v2297_v33 = vpop.eup %2296  ;;  %2095 = vmatprep.subr.bf16.mxu0 %v2356_v3 }
 0x4f5   :  { %v496_v34 = vsel %vm161_vm2, %v2297_v33, 0.0  ;;  %v703_v6 = vpop.permute.xlu0 %702 }
 0x4f6   :  { %497 = vadd.xlane.f32.xlu1 %v496_v34 }
 0x4fc   :  { %v2299_v35 = vpop.eup %2298 }
 0x4fd   :  { %v499_v36 = vsel %vm161_vm2, %v2299_v35, 0.0 }
 0x4fe   :  { %500 = vadd.xlane.f32.xlu1 %v499_v36 }
 0x50f   :  { %508 = vrot.lane.b32.xlu1 %v2488_v15, %s2362_s18 }
 0x513   :  { %704 = vrot.lane.b32.xlu1 %v2488_v15, %s2364_s20 }
 0x517   :  { %754 = vrot.lane.b32.xlu1 %v2491_v18, %s2364_s20 }
 0x51b   :  { %752 = vrot.lane.b32.xlu1 %v2491_v18, %s2363_s19 }
 0x583   :  { %v498_v37 = vpop.xlane.xlu1 %497 }
 0x584   :  { %2300 = vrcp.f32 %v498_v37 }
 0x58b   :  { %v501_v38 = vpop.xlane.xlu1 %500 }
 0x58c   :  { %2302 = vrcp.f32 %v501_v38 }
 0x58e   :  { %v2301_v39 = vpop.eup %2300 }
 0x58f   :  { %v509_v40 = vpop.permute.xlu1 %508  ;;  %v504_v41 = vmul.f32 %v2301_v39, %v2297_v33 }
 0x590   :  { %v514_v42 = vsel %vm287_vm3, %v509_v40, 0 }
 0x591   :  { %2078 = vmatpush3.bf16.msra.mxu1 %v514_v42  ;;  %v506_v43 = vpack.c.bf16 %v504_v41, %v504_v41 }
 0x592   :  { %2089 = vmatprep.subr.bf16.mxu1 %v2356_v3 }
 0x593   :  { %v705_v50 = vpop.permute.xlu1 %704 }
 0x594   :  { %2080 = vmatmul.mubr.msk.bf16.vlgmr.msra.gmra.mrb[0].mxu1 %vm161_vm2, %v506_v43  ;;  %v710_v1 = vsel %vm161_vm2, %v705_v50, 0 }
 0x595   :  { %2091 = vmatprep.mubr.msk.bf16.mxu1 %vm2357_vm0, %v2356_v3  ;;  %2090 = vmatpush3.bf16.msra.mxu1 %v612_v56  ;;  %v1930_v56 = vld [vmem:[%s2931_s3 + $0x10] sm:$0xff] }
 0x596   :  { %v2303_v46 = vpop.eup %2302  ;;  %2101 = vmatprep.subr.bf16.mxu1 %v2356_v3 }
 0x597   :  { %v505_v47 = vmul.f32 %v2303_v46, %v2299_v35  ;;  %v755_v51 = vpop.permute.xlu1 %754 }
 0x598   :  { %v760_v52 = vsel %vm161_vm2, %v755_v51, 0 }
 0x599   :  { %v507_v48 = vpack.c.bf16 %v505_v47, %v505_v47 }
 0x59b   :  { %2086 = vmatmul.mubr.msk.bf16.vlgmr.msra.gmra.mrb[28].mxu0 %vm161_vm2, %v507_v48  ;;  %v753_v53 = vpop.permute.xlu1 %752 }
 0x59c   :  { %2096 = vmatpush3.bf16.msra.mxu0 %v659_v49  ;;  %2097 = vmatprep.mubr.msk.bf16.mxu0 %vm2357_vm0, %v2356_v3 }
 0x59d   :  { %2107 = vmatprep.subr.bf16.mxu0 %v2356_v3 }
 0x5a3   :  { %2098 = vmatmul.mubr.msk.bf16.vlgmr.msra.gmra.mrb[32].mxu0 %vm161_vm2, %v380_v5 }
 0x5a4   :  { %2109 = vmatprep.mubr.msk.bf16.mxu0 %vm2357_vm0, %v2356_v3 }
 0x5a5   :  { %2108 = vmatpush3.bf16.xpose.msra.mxu0 %v760_v52 }
 0x5a6   :  { %2119 = vmatprep.subr.bf16.mxu0 %v2356_v3 }
 0x5ac   :  { %2110 = vmatmul.mubr.msk.bf16.vlgmr.msra.gmra.mrb[36].mxu0 %vm161_vm2, %v753_v53 }
 0x5ad   :  { %2121 = vmatprep.mubr.msk.bf16.mxu0 %vm2357_vm0, %v2356_v3 }
 0x667   :  { %v550_v57 = vpop.f32.mrb[0].mxu1 }
 0x668   :  { %v2081_v58 = vpop.f32.mrb[1].mxu1 }
 0x669   :  { %v553_v59 = vpop.f32.mrb[2].mxu1 }
 0x66a   :  { %v2082_v60 = vpop.f32.mrb[3].mxu1 }
 0x66e   :  { %v598_v61 = vpop.f32.mrb[28].mxu0 }
 0x66f   :  { %v606_v62 = vpack.c.bf16 %v598_v61, %v550_v57  ;;  %v2087_v63 = vpop.f32.mrb[29].mxu0  ;;  %v927_v57 = vpack.c.bf16 %v1930_v56, %v1930_v56 }
 0x670   :  { %v601_v0 = vpop.f32.mrb[30].mxu0 }
 0x671   :  { %v2088_v2 = vpop.f32.mrb[31].mxu0  ;;  %2092 = vmatmul.mubr.msk.bf16.vlgmr.msra.gmra.mrb[4].mxu1 %vm161_vm2, %v606_v62  ;;  %v932_v58 = vsel %vm287_vm3, %v927_v57, 0 }
 0x672   :  { %2102 = vmatpush3.bf16.xpose.msra.mxu1 %v710_v1  ;;  %2103 = vmatprep.mubr.msk.bf16.mxu1 %vm2357_vm0, %v2356_v3 }
 0x673   :  { %2113 = vmatprep.subr.bf16.mxu1 %v2356_v3 }
 0x676   :  { %v695_v4 = vpop.f32.mrb[32].mxu0 }
 0x677   :  { %v2099_v5 = vpop.f32.mrb[33].mxu0 }
 0x678   :  { %v698_v9 = vpop.f32.mrb[34].mxu0 }
 0x679   :  { %v2100_v10 = vpop.f32.mrb[35].mxu0  ;;  %2104 = vmatmul.mubr.msk.bf16.vlgmr.msra.gmra.mrb[8].mxu1 %vm161_vm2, %v703_v6 }
 0x67a   :  { %2115 = vmatprep.mubr.msk.bf16.mxu1 %vm2357_vm0, %v2356_v3 }
 0x67f   :  { %v796_v11 = vpop.f32.mrb[36].mxu0 }
 0x680   :  { %v803_v12 = vmul.f32 0.35355338, %v796_v11  ;;  %v2111_v13 = vpop.f32.mrb[37].mxu0 }
 0x681   :  { %v799_v14 = vpop.f32.mrb[38].mxu0 }
 0x682   :  { %v2112_v16 = vpop.f32.mrb[39].mxu0  ;;  %v807_v17 = vsel %vm161_vm2, %v803_v12, -inf }
 0x683   :  { %808 = vmax.xlane.f32.xlu1 %v807_v17 }
 0x694   :  { %828 = vrot.lane.b32.xlu1 %v2488_v15, %s2365_s25 }
 0x698   :  { %979 = vrot.lane.b32.xlu1 %v2488_v15, %s2366_s26 }
 0x69c   :  { %1029 = vrot.lane.b32.xlu1 %v2491_v18, %s2366_s26 }
 0x6a0   :  { %1027 = vrot.lane.b32.xlu1 %v2491_v18, %s2367_s27 }
 0x710   :  { %v809_v19 = vpop.xlane.xlu1 %808 }
 0x711   :  { %v811_v22 = vsub.f32 %v803_v12, %v809_v19 }
 0x713   :  { %v814_v23 = vmul.f32 1.442695, %v811_v22 }
 0x714   :  { %v829_v20 = vpop.permute.xlu1 %828 }
 0x715   :  { %v834_v21 = vsel %vm287_vm3, %v829_v20, 0  ;;  %2304 = vpow2.f32 %v814_v23 }
 0x716   :  { %2114 = vmatpush3.bf16.msra.mxu1 %v834_v21 }
 0x717   :  { %2125 = vmatprep.subr.bf16.mxu1 %v2356_v3 }
 0x718   :  { %v980_v51 = vpop.permute.xlu1 %979 }
 0x719   :  { %v985_v53 = vsel %vm161_vm2, %v980_v51, 0 }
 0x71c   :  { %v1030_v63 = vpop.permute.xlu1 %1029 }
 0x71d   :  { %v1035_v5 = vsel %vm161_vm2, %v1030_v63, 0 }
 0x71f   :  { %v2305_v36 = vpop.eup %2304 }
 0x720   :  { %v819_v37 = vsel %vm161_vm2, %v2305_v36, 0.0  ;;  %v1028_v16 = vpop.permute.xlu1 %1027 }
 0x744   :  { %v648_v24 = vpop.f32.mrb[4].mxu1 }
 0x745   :  { %v2600_v25 = vadd.f32 %v695_v4, %v648_v24  ;;  %v2093_v26 = vpop.f32.mrb[5].mxu1 }
 0x746   :  { %v651_v27 = vpop.f32.mrb[6].mxu1 }
 0x747   :  { %v2602_v28 = vadd.f32 %v698_v9, %v651_v27  ;;  %v2094_v29 = vpop.f32.mrb[7].mxu1 }
 0x74c   :  { %v746_v30 = vpop.f32.mrb[8].mxu1 }
 0x74d   :  { %v802_v31 = vmul.f32 0.35355338, %v746_v30  ;;  %v2105_v32 = vpop.f32.mrb[9].mxu1 }
 0x74e   :  { %v749_v33 = vpop.f32.mrb[10].mxu1 }
 0x74f   :  { %v2106_v34 = vpop.f32.mrb[11].mxu1  ;;  %v804_v35 = vsel %vm161_vm2, %v802_v31, -inf }
 0x750   :  { %805 = vmax.xlane.f32.xlu0 %v804_v35 }
 0x754   :  { %820 = vadd.xlane.f32.xlu0 %v819_v37 }
 0x7dd   :  { %v806_v38 = vpop.xlane.xlu0 %805 }
 0x7de   :  { %v810_v39 = vsub.f32 %v802_v31, %v806_v38 }
 0x7e0   :  { %v812_v40 = vmul.f32 1.442695, %v810_v39 }
 0x7e1   :  { %v821_v43 = vpop.xlane.xlu0 %820 }
 0x7e2   :  { %2306 = vpow2.f32 %v812_v40 }
 0x7e3   :  { %2308 = vrcp.f32 %v821_v43 }
 0x7ec   :  { %v2307_v41 = vpop.eup %2306 }
 0x7ed   :  { %v816_v42 = vsel %vm161_vm2, %v2307_v41, 0.0  ;;  %v2309_v44 = vpop.eup %2308 }
 0x7ee   :  { %817 = vadd.xlane.f32.xlu0 %v816_v42  ;;  %v825_v46 = vmul.f32 %v2309_v44, %v2305_v36 }
 0x7f0   :  { %v827_v49 = vpack.c.bf16 %v825_v46, %v825_v46 }
 0x804   :  { %876 = vrot.lane.b32.xlu0 %v2491_v18, %s2365_s25 }
 0x808   :  { %977 = vrot.lane.b32.xlu0 %v2488_v15, %s2367_s27 }
 0x87b   :  { %v818_v45 = vpop.xlane.xlu0 %817 }
 0x87c   :  { %2310 = vrcp.f32 %v818_v45  ;;  %v1936_v45 = vld [vmem:[%s2931_s3 + $0x18] sm:$0xff] }
 0x87d   :  { %v1202_v46 = vpack.c.bf16 %v1936_v45, %v1936_v45 }
 0x87f   :  { %v877_v47 = vpop.permute.xlu0 %876 }
 0x880   :  { %v882_v48 = vsel %vm287_vm3, %v877_v47, 0  ;;  %v1207_v47 = vsel %vm287_vm3, %v1202_v46, 0 }
 0x881   :  { %2120 = vmatpush3.bf16.msra.mxu0 %v882_v48 }
 0x882   :  { %2131 = vmatprep.subr.bf16.mxu0 %v2356_v3 }
 0x883   :  { %v978_v55 = vpop.permute.xlu0 %977 }
 0x884   :  { %2122 = vmatmul.mubr.msk.bf16.vlgmr.msra.gmra.mrb[40].mxu0 %vm161_vm2, %v827_v49 }
 0x885   :  { %2133 = vmatprep.mubr.msk.bf16.mxu0 %vm2357_vm0, %v2356_v3 }
 0x886   :  { %v2311_v50 = vpop.eup %2310 }
 0x887   :  { %v824_v52 = vmul.f32 %v2311_v50, %v2307_v41 }
 0x889   :  { %v826_v54 = vpack.c.bf16 %v824_v52, %v824_v52 }
 0x88a   :  { %2132 = vmatpush3.bf16.xpose.msra.mxu0 %v985_v53 }
 0x88b   :  { %2116 = vmatmul.mubr.msk.bf16.vlgmr.msra.gmra.mrb[12].mxu1 %vm161_vm2, %v826_v54  ;;  %2143 = vmatprep.subr.bf16.mxu0 %v2356_v3 }
 0x88c   :  { %2127 = vmatprep.mubr.msk.bf16.mxu1 %vm2357_vm0, %v2356_v3  ;;  %2126 = vmatpush3.bf16.msra.mxu1 %v932_v58 }
 0x88d   :  { %2137 = vmatprep.subr.bf16.mxu1 %v2356_v3 }
 0x891   :  { %2134 = vmatmul.mubr.msk.bf16.vlgmr.msra.gmra.mrb[44].mxu0 %vm161_vm2, %v978_v55 }
 0x892   :  { %2145 = vmatprep.mubr.msk.bf16.mxu0 %vm2357_vm0, %v2356_v3 }
 0x957   :  { %v918_v59 = vpop.f32.mrb[40].mxu0 }
 0x958   :  { %v2123_v60 = vpop.f32.mrb[41].mxu0 }
 0x959   :  { %v921_v61 = vpop.f32.mrb[42].mxu0 }
 0x95a   :  { %v2124_v62 = vpop.f32.mrb[43].mxu0 }
 0x95b   :  { %v1938_v62 = vld [vmem:[%s2932_s4] ss:$0 sm:$0xff] }
 0x95e   :  { %v870_v0 = vpop.f32.mrb[12].mxu1 }
 0x95f   :  { %v926_v1 = vpack.c.bf16 %v918_v59, %v870_v0  ;;  %v2117_v2 = vpop.f32.mrb[13].mxu1 }
 0x960   :  { %v873_v4 = vpop.f32.mrb[14].mxu1 }
 0x961   :  { %v2118_v6 = vpop.f32.mrb[15].mxu1  ;;  %2128 = vmatmul.mubr.msk.bf16.vlgmr.msra.gmra.mrb[16].mxu1 %vm161_vm2, %v926_v1 }
 0x962   :  { %2138 = vmatpush3.bf16.xpose.msra.mxu1 %v1035_v5  ;;  %2139 = vmatprep.mubr.msk.bf16.mxu1 %vm2357_vm0, %v2356_v3 }
 0x963   :  { %2149 = vmatprep.subr.bf16.mxu1 %v2356_v3 }
 0x964   :  { %v1021_v9 = vpop.f32.mrb[44].mxu0 }
 0x965   :  { %v1077_v10 = vmul.f32 0.35355338, %v1021_v9  ;;  %v2135_v11 = vpop.f32.mrb[45].mxu0 }
 0x966   :  { %v1024_v12 = vpop.f32.mrb[46].mxu0 }
 0x967   :  { %v2136_v13 = vpop.f32.mrb[47].mxu0  ;;  %v1079_v14 = vsel %vm161_vm2, %v1077_v10, -inf }
 0x968   :  { %1080 = vmax.xlane.f32.xlu0 %v1079_v14 }
 0x969   :  { %2140 = vmatmul.mubr.msk.bf16.vlgmr.msra.gmra.mrb[20].mxu1 %vm161_vm2, %v1028_v16 }
 0x96a   :  { %2151 = vmatprep.mubr.msk.bf16.mxu1 %vm2357_vm0, %v2356_v3 }
 0x9f5   :  { %v1081_v17 = vpop.xlane.xlu0 %1080 }
 0x9f6   :  { %v1085_v19 = vsub.f32 %v1077_v10, %v1081_v17 }
 0x9f8   :  { %v1087_v20 = vmul.f32 1.442695, %v1085_v19 }
 0x9fa   :  { %2312 = vpow2.f32 %v1087_v20 }
 0xa04   :  { %v2313_v21 = vpop.eup %2312 }
 0xa05   :  { %v1091_v22 = vsel %vm161_vm2, %v2313_v21, 0.0 }
 0xa06   :  { %1092 = vadd.xlane.f32.xlu0 %v1091_v22 }
 0xa34   :  { %v968_v23 = vpop.f32.mrb[16].mxu1 }
 0xa35   :  { %v975_v24 = vadd.f32 %v968_v23, %v2600_v25  ;;  %v2129_v26 = vpop.f32.mrb[17].mxu1 }
 0xa36   :  { %v971_v27 = vpop.f32.mrb[18].mxu1  ;;  %v1306_v26 = vld [vmem:[%s2935_s7 + $0x8] sm:$0xff] }
 0xa37   :  { %v2641_v29 = vadd.f32 %v971_v27, %v2602_v28  ;;  %v2130_v30 = vpop.f32.mrb[19].mxu1 }
 0xa38   :  { %v1308_v30 = vld [vmem:[%s2935_s7 + $0x18] sm:$0xff] }
 0xa3c   :  { %v1071_v31 = vpop.f32.mrb[20].mxu1 }
 0xa3d   :  { %v1078_v32 = vmul.f32 0.35355338, %v1071_v31  ;;  %v2141_v33 = vpop.f32.mrb[21].mxu1 }
 0xa3e   :  { %v1074_v34 = vpop.f32.mrb[22].mxu1  ;;  %v1365_v33 = vld [vmem:[%s2937_s9 + $0x8] sm:$0xff] }
 0xa3f   :  { %v2142_v35 = vpop.f32.mrb[23].mxu1  ;;  %v1082_v36 = vsel %vm161_vm2, %v1078_v32, -inf  ;;  %v1366_v34 = vld [vmem:[%s2937_s9 + $0x10] sm:$0xff] }
 0xa40   :  { %1083 = vmax.xlane.f32.xlu1 %v1082_v36  ;;  %v1367_v36 = vld [vmem:[%s2937_s9 + $0x18] sm:$0xff] }
 0xa51   :  { %1103 = vrot.lane.b32.xlu1 %v2488_v15, %s2368_s1 }
 0xa93   :  { %v1093_v37 = vpop.xlane.xlu0 %1092 }
 0xa94   :  { %2314 = vrcp.f32 %v1093_v37  ;;  %v1374_v37 = vpack.c.bf16 %v1367_v36, %v1366_v34 }
 0xa9e   :  { %v2315_v25 = vpop.eup %2314 }
 0xa9f   :  { %v1099_v40 = vmul.f32 %v2315_v25, %v2313_v21 }
 0xaa1   :  { %v1101_v43 = vpack.c.bf16 %v1099_v40, %v1099_v40 }
 0xacd   :  { %v1084_v38 = vpop.xlane.xlu1 %1083 }
 0xace   :  { %v1086_v39 = vsub.f32 %v1078_v32, %v1084_v38  ;;  %v1364_v32 = vld [vmem:[%s2937_s9] sm:$0xff] }
 0xacf   :  { %v1373_v35 = vpack.c.bf16 %v1365_v33, %v1364_v32  ;;  %v65_v32 = vld [vmem:[%s2941_s13 + $0x10] sm:$0xff]  ;;  %v66_v33 = vld [vmem:[%s2941_s13 + $0x18] sm:$0xff] }
 0xad0   :  { %v1089_v28 = vmul.f32 1.442695, %v1086_v39  ;;  %v1475_v34 = vpack.c.bf16 %v66_v33, %v65_v32  ;;  %v81_v33 = vld [vmem:[%s2941_s13 + $0x90] sm:$0xff] }
 0xad1   :  { %v1104_v41 = vpop.permute.xlu1 %1103 }
 0xad2   :  { %2316 = vpow2.f32 %v1089_v28  ;;  %v1109_v42 = vsel %vm287_vm3, %v1104_v41, 0 }
 0xad3   :  { %2144 = vmatpush3.bf16.msra.mxu0 %v1109_v42 }
 0xad4   :  { %2155 = vmatprep.subr.bf16.mxu0 %v2356_v3 }
 0xad6   :  { %2146 = vmatmul.mubr.msk.bf16.vlgmr.msra.gmra.mrb[48].mxu0 %vm161_vm2, %v1101_v43  ;;  %v1939_v43 = vld [vmem:[%s2933_s5] ss:$0 sm:$0xff] }
 0xad7   :  { %2157 = vmatprep.mubr.msk.bf16.mxu0 %vm2357_vm0, %v2356_v3  ;;  %2156 = vmatpush3.bf16.msra.mxu0 %v1207_v47  ;;  %v1940_v47 = vld [vmem:[%s2934_s6] ss:$0 sm:$0xff] }
 0xad8   :  { %2169 = vmatprep.subr.bf16.mxu0 %v2356_v3 }
 0xadc   :  { %v2317_v15 = vpop.eup %2316 }
 0xadd   :  { %v1094_v44 = vsel %vm161_vm2, %v2317_v15, 0.0 }
 0xade   :  { %1095 = vadd.xlane.f32.xlu0 %v1094_v44 }
 0xaf4   :  { %1151 = vrot.lane.b32.xlu0 %v2491_v18, %s2368_s1 }
 0xb6b   :  { %v1096_v48 = vpop.xlane.xlu0 %1095 }
 0xb6c   :  { %2318 = vrcp.f32 %v1096_v48 }
 0xb6f   :  { %v1152_v49 = vpop.permute.xlu0 %1151 }
 0xb70   :  { %v1157_v50 = vsel %vm287_vm3, %v1152_v49, 0 }
 0xb71   :  { %2150 = vmatpush3.bf16.msra.mxu1 %v1157_v50 }
 0xb72   :  { %2161 = vmatprep.subr.bf16.mxu1 %v2356_v3 }
 0xb76   :  { %v2319_v51 = vpop.eup %2318 }
 0xb77   :  { %v1100_v18 = vmul.f32 %v2319_v51, %v2317_v15 }
 0xb79   :  { %v1102_v52 = vpack.c.bf16 %v1100_v18, %v1100_v18  ;;  %v1368_v18 = vld [vmem:[%s2937_s9 + $0x20] sm:$0xff] }
 0xb7b   :  { %2152 = vmatmul.mubr.msk.bf16.vlgmr.msra.gmra.mrb[24].mxu1 %vm161_vm2, %v1102_v52  ;;  %v1369_v52 = vld [vmem:[%s2937_s9 + $0x28] sm:$0xff] }
 0xb7c   :  { %2165 = vmatprep.mubr.msk.bf16.mxu1 %vm2357_vm0, %v2356_v3 }
 0xba9   :  { %v1145_v53 = vpop.f32.mrb[48].mxu0 }
 0xbaa   :  { %v2147_v54 = vpop.f32.mrb[49].mxu0 }
 0xbab   :  { %v1148_v55 = vpop.f32.mrb[50].mxu0  ;;  %v1370_v54 = vld [vmem:[%s2937_s9 + $0x30] sm:$0xff] }
 0xbac   :  { %v2148_v56 = vpop.f32.mrb[51].mxu0  ;;  %v1371_v55 = vld [vmem:[%s2937_s9 + $0x38] sm:$0xff] }
 0xbad   :  { %v1376_v56 = vpack.c.bf16 %v1371_v55, %v1370_v54 }
 0xc4e   :  { %v1193_v57 = vpop.f32.mrb[24].mxu1 }
 0xc4f   :  { %v1201_v58 = vpack.c.bf16 %v1193_v57, %v1145_v53  ;;  %v2153_v59 = vpop.f32.mrb[25].mxu1  ;;  %v1375_v53 = vpack.c.bf16 %v1369_v52, %v1368_v18  ;;  %v1941_v57 = vld [vmem:[%s2936_s8] ss:$0 sm:$0xff]  ;;  %v68_v52 = vld [vmem:[%s2941_s13 + $0x28] sm:$0xff] }
 0xc50   :  { %v1196_v60 = vpop.f32.mrb[26].mxu1  ;;  %v67_v18 = vld [vmem:[%s2941_s13 + $0x20] sm:$0xff] }
 0xc51   :  { %v2154_v61 = vpop.f32.mrb[27].mxu1  ;;  %2158 = vmatmul.mubr.msk.bf16.vlgmr.msra.gmra.mrb[52].mxu0 %vm161_vm2, %v1201_v58  ;;  %v1534_v54 = vpack.c.bf16 %v68_v52, %v67_v18  ;;  %v91_v52 = vld [vmem:[%s2941_s13 + $0xe0] sm:$0xff] }
 0xc52   :  { %2177 = vmatprep.mubr.msk.bf16.mxu0 %vm2357_vm0, %v2356_v3  ;;  %2170 = vmatpush3.bf16.msra.mxu0 %v1373_v35 }
 0xc53   :  { %2171 = vmatprep.subr.bf16.mxu0 %v2356_v3 }
 0xc56   :  { %2172 = vmatpush3.bf16.msra.mxu0 %v1374_v37 }
 0xc57   :  { %2173 = vmatprep.subr.bf16.mxu0 %v2356_v3 }
 0xc5a   :  { %2174 = vmatpush3.bf16.msra.mxu0 %v1375_v53 }
 0xc5b   :  { %2175 = vmatprep.subr.bf16.mxu0 %v2356_v3 }
 0xc5e   :  { %2176 = vmatpush3.bf16.msra.mxu0 %v1376_v56 }
 0xd24   :  { %v1243_v63 = vpop.f32.mrb[52].mxu0 }
 0xd25   :  { %v1250_v0 = vadd.f32 %v1243_v63, %v975_v24  ;;  %v2159_v1 = vpop.f32.mrb[53].mxu0 }
 0xd26   :  { %v1246_v2 = vpop.f32.mrb[54].mxu0 }
 0xd27   :  { %v1258_v4 = vadd.f32 %v1938_v62, %v1250_v0  ;;  %v1251_v5 = vadd.f32 %v1246_v2, %v2641_v29  ;;  %v2160_v6 = vpop.f32.mrb[55].mxu0  ;;  %v1307_v29 = vld [vmem:[%s2935_s7 + $0x10] sm:$0xff] }
 0xd28   :  { %v1311_v31 = vpack.c.bf16 %v1308_v30, %v1307_v29  ;;  %v63_v29 = vld [vmem:[%s2941_s13] sm:$0xff]  ;;  %v64_v30 = vld [vmem:[%s2941_s13 + $0x8] sm:$0xff] }
 0xd29   :  { %v1259_v9 = vadd.f32 %v1938_v62, %v1251_v5  ;;  %v1260_v10 = vadd.f32 %v1258_v4, %v2471_v7  ;;  %v1943_v4 = vld [vmem:[%s2938_s10] ss:$0 sm:$0xff] }
 0xd2b   :  { %v1262_v11 = vsel %vm108_vm1, %v1260_v10, 0.0  ;;  %v1261_v12 = vadd.f32 %v1259_v9, %v2476_v8  ;;  %v1305_v8 = vld [vmem:[%s2935_s7] sm:$0xff] }
 0xd2c   :  { %1263 = vadd.xlane.f32.xlu1 %v1262_v11  ;;  %v1310_v27 = vpack.c.bf16 %v1306_v26, %v1305_v8 }
 0xd2d   :  { %v1265_v13 = vsel %vm108_vm1, %v1261_v12, 0.0 }
 0xd2e   :  { %1266 = vadd.xlane.f32.xlu0 %v1265_v13  ;;  %2162 = vmatpush3.bf16.msra.mxu1 %v1310_v27 }
 0xd2f   :  { %2163 = vmatprep.subr.bf16.mxu1 %v2356_v3 }
 0xd32   :  { %2164 = vmatpush3.bf16.msra.mxu1 %v1311_v31  ;;  %v1474_v31 = vpack.c.bf16 %v64_v30, %v63_v29  ;;  %v80_v29 = vld [vmem:[%s2941_s13 + $0x88] sm:$0xff] }
 0xd33   :  { %2181 = vmatprep.subr.bf16.mxu1 %v2356_v3 }
 0xdb9   :  { %v1264_v14 = vpop.xlane.xlu1 %1263 }
 0xdba   :  { %v1269_v16 = vmul.f32 0.03125, %v1264_v14 }
 0xdbb   :  { %v1267_v17 = vpop.xlane.xlu0 %1266 }
 0xdbc   :  { %v1271_v19 = vsub.f32 %v1260_v10, %v1269_v16  ;;  %v1270_v20 = vmul.f32 0.03125, %v1267_v17 }
 0xdbe   :  { %v1272_v21 = vsub.f32 %v1261_v12, %v1270_v20  ;;  %v1273_v22 = vmul.f32 %v1271_v19, %v1271_v19 }
 0xdc0   :  { %v1275_v23 = vsel %vm108_vm1, %v1273_v22, 0.0  ;;  %v1274_v24 = vmul.f32 %v1272_v21, %v1272_v21 }
 0xdc1   :  { %1276 = vadd.xlane.f32.xlu1 %v1275_v23 }
 0xdc2   :  { %v1278_v7 = vsel %vm108_vm1, %v1274_v24, 0.0 }
 0xdc3   :  { %1279 = vadd.xlane.f32.xlu0 %v1278_v7 }
 0xe4e   :  { %v1277_v25 = vpop.xlane.xlu1 %1276 }
 0xe4f   :  { %v1281_v38 = vmul.f32 0.03125, %v1277_v25 }
 0xe50   :  { %v1280_v39 = vpop.xlane.xlu0 %1279 }
 0xe51   :  { %v1283_v40 = vadd.f32 1e-05, %v1281_v38  ;;  %v1282_v28 = vmul.f32 0.03125, %v1280_v39 }
 0xe53   :  { %2320 = vrsqrt.f32 %v1283_v40  ;;  %v1284_v41 = vadd.f32 1e-05, %v1282_v28  ;;  %v1945_v28 = vld [vmem:[%s2939_s11] ss:$0 sm:$0xff] }
 0xe55   :  { %2322 = vrsqrt.f32 %v1284_v41 }
 0xe5d   :  { %v2321_v42 = vpop.eup %2320 }
 0xe5e   :  { %v1287_v15 = vmul.f32 %v2321_v42, %v1271_v19 }
 0xe5f   :  { %v2323_v44 = vpop.eup %2322 }
 0xe60   :  { %v1295_v45 = vmul.f32 %v1939_v43, %v1287_v15  ;;  %v1288_v46 = vmul.f32 %v2323_v44, %v1272_v21 }
 0xe62   :  { %v1296_v48 = vmul.f32 %v1939_v43, %v1288_v46  ;;  %v1303_v49 = vadd.f32 %v1940_v47, %v1295_v45  ;;  %v1946_v43 = vld [vmem:[%s2940_s12] ss:$0 sm:$0xff] }
 0xe64   :  { %v1304_v50 = vadd.f32 %v1940_v47, %v1296_v48 }
 0xe66   :  { %v1309_v51 = vpack.c.bf16 %v1304_v50, %v1303_v49 }
 0xe68   :  { %2166 = vmatmul.mubr.msk.bf16.vlgmr.msra.gmra.mrb[28].mxu1 %vm108_vm1, %v1309_v51 }
 0xe69   :  { %2185 = vmatprep.mubr.msk.bf16.mxu1 %vm2357_vm0, %v2356_v3  ;;  %2182 = vmatpush3.bf16.msra.mxu1 %v1474_v31 }
 0xe6a   :  { %2183 = vmatprep.subr.bf16.mxu1 %v2356_v3 }
 0xe6d   :  { %2184 = vmatpush3.bf16.msra.mxu1 %v1475_v34  ;;  %v82_v34 = vld [vmem:[%s2941_s13 + $0x98] sm:$0xff] }
 0xe6e   :  { %2189 = vmatprep.subr.bf16.mxu1 %v2356_v3 }
 0xf3b   :  { %v1355_v58 = vpop.f32.mrb[28].mxu1 }
 0xf3c   :  { %v1356_v59 = vadd.f32 %v1941_v57, %v1355_v58  ;;  %v2167_v60 = vpop.f32.mrb[29].mxu1 }
 0xf3d   :  { %v1358_v61 = vpop.f32.mrb[30].mxu1 }
 0xf3e   :  { %v1359_v62 = vadd.f32 %v1941_v57, %v1358_v61  ;;  %v2168_v63 = vpop.f32.mrb[31].mxu1  ;;  %v1362_v0 = vmax.f32 %v1356_v59, 0.0  ;;  %v69_v61 = vld [vmem:[%s2941_s13 + $0x30] sm:$0xff] }
 0xf40   :  { %v1363_v1 = vmax.f32 %v1359_v62, 0.0  ;;  %v70_v62 = vld [vmem:[%s2941_s13 + $0x38] sm:$0xff] }
 0xf42   :  { %v1372_v2 = vpack.c.bf16 %v1363_v1, %v1362_v0  ;;  %v1535_v1 = vpack.c.bf16 %v70_v62, %v69_v61 }
 0xf44   :  { %2178 = vmatmul.mubr.msk.bf16.vlgmr.msra.gmra.mrb[56].mxu0 %vm1383_vm4, %v1372_v2 }
0x1017   :  { %v1421_v5 = vpop.f32.mrb[56].mxu0 }
0x1018   :  { %v1422_v6 = vadd.f32 %v1943_v4, %v1421_v5  ;;  %v2179_v9 = vpop.f32.mrb[57].mxu0  ;;  %v72_v5 = vld [vmem:[%s2941_s13 + $0x48] sm:$0xff] }
0x1019   :  { %v1424_v10 = vpop.f32.mrb[58].mxu0 }
0x101a   :  { %v1425_v11 = vadd.f32 %v1943_v4, %v1424_v10  ;;  %v2180_v12 = vpop.f32.mrb[59].mxu0  ;;  %v1428_v13 = vadd.f32 %v1422_v6, %v1303_v49  ;;  %v71_v4 = vld [vmem:[%s2941_s13 + $0x40] sm:$0xff] }
0x101b   :  { %v1583_v9 = vpack.c.bf16 %v72_v5, %v71_v4  ;;  %v74_v12 = vld [vmem:[%s2941_s13 + $0x58] sm:$0xff] }
0x101c   :  { %v1430_v14 = vsel %vm108_vm1, %v1428_v13, 0.0  ;;  %v1429_v16 = vadd.f32 %v1425_v11, %v1304_v50  ;;  %v73_v11 = vld [vmem:[%s2941_s13 + $0x50] sm:$0xff] }
0x101d   :  { %1431 = vadd.xlane.f32.xlu0 %v1430_v14 }
0x101e   :  { %v1433_v17 = vsel %vm108_vm1, %v1429_v16, 0.0 }
0x101f   :  { %1434 = vadd.xlane.f32.xlu1 %v1433_v17  ;;  %v75_v17 = vld [vmem:[%s2941_s13 + $0x60] sm:$0xff] }
0x10aa   :  { %v1432_v19 = vpop.xlane.xlu0 %1431 }
0x10ab   :  { %v1436_v20 = vmul.f32 0.03125, %v1432_v19  ;;  %v76_v19 = vld [vmem:[%s2941_s13 + $0x68] sm:$0xff] }
0x10ac   :  { %v1435_v21 = vpop.xlane.xlu1 %1434 }
0x10ad   :  { %v1438_v22 = vsub.f32 %v1428_v13, %v1436_v20  ;;  %v1437_v23 = vmul.f32 0.03125, %v1435_v21  ;;  %v1584_v13 = vpack.c.bf16 %v74_v12, %v73_v11  ;;  %v1633_v21 = vpack.c.bf16 %v76_v19, %v75_v17 }
0x10af   :  { %v1439_v24 = vsub.f32 %v1429_v16, %v1437_v23  ;;  %v1440_v7 = vmul.f32 %v1438_v22, %v1438_v22  ;;  %v77_v23 = vld [vmem:[%s2941_s13 + $0x70] sm:$0xff] }
0x10b1   :  { %v1442_v8 = vsel %vm108_vm1, %v1440_v7, 0.0  ;;  %v1441_v26 = vmul.f32 %v1439_v24, %v1439_v24 }
0x10b2   :  { %1443 = vadd.xlane.f32.xlu0 %v1442_v8 }
0x10b3   :  { %v1445_v27 = vsel %vm108_vm1, %v1441_v26, 0.0 }
0x10b4   :  { %1446 = vadd.xlane.f32.xlu1 %v1445_v27  ;;  %v79_v27 = vld [vmem:[%s2941_s13 + $0x80] sm:$0xff] }
0x10b5   :  { %v1683_v31 = vpack.c.bf16 %v80_v29, %v79_v27 }
0x113f   :  { %v1444_v35 = vpop.xlane.xlu0 %1443 }
0x1140   :  { %v1448_v36 = vmul.f32 0.03125, %v1444_v35  ;;  %v1684_v35 = vpack.c.bf16 %v82_v34, %v81_v33 }
0x1141   :  { %v1447_v37 = vpop.xlane.xlu1 %1446 }
0x1142   :  { %v1450_v25 = vadd.f32 1e-05, %v1448_v36  ;;  %v1449_v38 = vmul.f32 0.03125, %v1447_v37 }
0x1144   :  { %2324 = vrsqrt.f32 %v1450_v25  ;;  %v1451_v39 = vadd.f32 1e-05, %v1449_v38  ;;  %v83_v25 = vld [vmem:[%s2941_s13 + $0xa0] sm:$0xff]  ;;  %v84_v38 = vld [vmem:[%s2941_s13 + $0xa8] sm:$0xff] }
0x1146   :  { %2326 = vrsqrt.f32 %v1451_v39 }
0x114e   :  { %v2325_v40 = vpop.eup %2324 }
0x114f   :  { %v1454_v41 = vmul.f32 %v2325_v40, %v1438_v22  ;;  %v1733_v40 = vpack.c.bf16 %v84_v38, %v83_v25 }
0x1150   :  { %v2327_v42 = vpop.eup %2326 }
0x1151   :  { %v1462_v15 = vmul.f32 %v1945_v28, %v1454_v41  ;;  %v1455_v44 = vmul.f32 %v2327_v42, %v1439_v24  ;;  %v78_v24 = vld [vmem:[%s2941_s13 + $0x78] sm:$0xff]  ;;  %v85_v41 = vld [vmem:[%s2941_s13 + $0xb0] sm:$0xff] }
0x1152   :  { %v1634_v7 = vpack.c.bf16 %v78_v24, %v77_v23  ;;  %v86_v42 = vld [vmem:[%s2941_s13 + $0xb8] sm:$0xff] }
0x1153   :  { %v1470_v45 = vadd.f32 %v1946_v43, %v1462_v15  ;;  %v1463_v46 = vmul.f32 %v1945_v28, %v1455_v44 }
0x1155   :  { %v1472_v47 = vpack.c.bf16 %v1470_v45, %v1470_v45  ;;  %v1471_v48 = vadd.f32 %v1946_v43, %v1463_v46  ;;  %v1734_v43 = vpack.c.bf16 %v86_v42, %v85_v41  ;;  %v87_v45 = vld [vmem:[%s2941_s13 + $0xc0] sm:$0xff]  ;;  %v88_v46 = vld [vmem:[%s2941_s13 + $0xc8] sm:$0xff] }
0x1157   :  { %v1473_v49 = vpack.c.bf16 %v1471_v48, %v1471_v48  ;;  %v2755_v50 = vunpack.c.l.b16 %v1472_v47  ;;  %v1783_v48 = vpack.c.bf16 %v88_v46, %v87_v45 }
0x1159   :  { %v2757_v51 = vunpack.c.l.b16 %v1473_v49  ;;  %v1785_v57 = vrot.slane %v2755_v50, 6  ;;  %v1835_v58 = vrot.slane %v2755_v50, 7  ;;  %v1536_v2 = vrot.slane %v2755_v50, 1 }
0x115a   :  { %v1585_v16 = vrot.slane %v2755_v50, 2  ;;  %v1635_v26 = vrot.slane %v2755_v50, 3  ;;  %v1685_v37 = vrot.slane %v2755_v50, 4  ;;  %v1735_v44 = vrot.slane %v2755_v50, 5 }
0x115b   :  { %v1480_v53 = vrot.slane %v2757_v51, 7  ;;  %v1786_v55 = vrot.slane %v2757_v51, 5  ;;  %v1836_v59 = vrot.slane %v2757_v51, 6  ;;  %v1537_v6 = vsel %vm1481_vm5, %v2757_v51, %v1536_v2 }
0x115c   :  { %v1538_v10 = vpack.c.b16 %v1537_v6, %v1537_v6  ;;  %v1586_v14 = vrot.slane %v2757_v51, 1  ;;  %v1636_v8 = vrot.slane %v2757_v51, 2  ;;  %v1686_v36 = vrot.slane %v2757_v51, 3 }
0x115d   :  { %v1482_v56 = vsel %vm1481_vm5, %v1480_v53, %v2755_v50  ;;  %v2779_v63 = vsel %vm1481_vm5, %v1786_v55, %v1785_v57  ;;  %v2782_v0 = vsel %vm1481_vm5, %v1836_v59, %v1835_v58  ;;  %v1736_v15 = vrot.slane %v2757_v51, 4  ;;  %v89_v51 = vld [vmem:[%s2941_s13 + $0xd0] sm:$0xff]  ;;  %v90_v50 = vld [vmem:[%s2941_s13 + $0xd8] sm:$0xff]  ;;  %v92_v53 = vld [vmem:[%s2941_s13 + $0xe8] sm:$0xff] }
0x115e   :  { %v1483_v60 = vpack.c.b16 %v1482_v56, %v1482_v56  ;;  %v1587_v20 = vsel %vm1481_vm5, %v1586_v14, %v1585_v16  ;;  %v1637_v30 = vsel %vm1481_vm5, %v1636_v8, %v1635_v26  ;;  %v1687_v39 = vsel %vm1481_vm5, %v1686_v36, %v1685_v37  ;;  %v93_v56 = vld [vmem:[%s2941_s13 + $0xf0] sm:$0xff]  ;;  %v94_v57 = vld [vmem:[%s2941_s13 + $0xf8] sm:$0xff]  ;;  %s2369_s13 = smov [#allocation2]  }
0x115f   :  { %v1588_v22 = vpack.c.b16 %v1587_v20, %v1587_v20  ;;  %v1638_v32 = vpack.c.b16 %v1637_v30, %v1637_v30  ;;  %v1688_v28 = vpack.c.b16 %v1687_v39, %v1687_v39  ;;  %v1737_v47 = vsel %vm1481_vm5, %v1736_v15, %v1735_v44 }
0x1160   :  { %2186 = vmatmul.mubr.msk.bf16.vlgmr.msra.gmra.mrb[32].mxu1 %vm108_vm1, %v1483_v60  ;;  %v1738_v49 = vpack.c.b16 %v1737_v47, %v1737_v47  ;;  %v1784_v18 = vpack.c.bf16 %v90_v50, %v89_v51  ;;  %v1788_v55 = vpack.c.b16 %v2779_v63, %v2779_v63  ;;  %v1834_v58 = vpack.c.bf16 %v94_v57, %v93_v56  ;;  %v1948_v60 = vld [vmem:[%s2942_s14] ss:$0 sm:$0xff]  ;;  %s1903_s14 = sshll.u32 %s2369_s13, 4  ;;  %s1904_s14 = int_to_ptr.vmem [resolvable:$true] %s1903_s14 }
0x1161   :  { %2190 = vmatpush3.bf16.msra.mxu1 %v1534_v54  ;;  %2193 = vmatprep.mubr.msk.bf16.mxu1 %vm2357_vm0, %v2356_v3  ;;  %v1833_v54 = vpack.c.bf16 %v92_v53, %v91_v52  ;;  %v1838_v59 = vpack.c.b16 %v2782_v0, %v2782_v0  ;;  %s2332_s11 = scalar_lea.vmem %s1904_s14, 32  ;;  %p2337_p1 = scmp.lt.s32.totalorder %s1904_s14, %s1904_s14 }
0x1162   :  { %2191 = vmatprep.subr.bf16.mxu1 %v2356_v3  ;;  %p2333_p0 = scmp.ne.s32.totalorder %s1904_s14, %s2332_s11  ;;  %p2338_p2 = scmp.lt.s32.totalorder %s2332_s11, %s2332_s11 }
0x1164   :  { %p2339_p3 = por %p2338_p2, %p2337_p1 }
0x1165   :  { %2192 = vmatpush3.bf16.msra.mxu1 %v1535_v1 }
0x1166   :  { %2197 = vmatprep.subr.bf16.mxu1 %v2356_v3  ;;  %p2340_p4 = pnand %p2339_p3, %p2333_p0 }
0x116c   :  { %2194 = vmatmul.mubr.msk.bf16.vlgmr.msra.gmra.mrb[32].mxu1 %vm108_vm1, %v1538_v10 }
0x116d   :  { %2198 = vmatpush3.bf16.msra.mxu1 %v1583_v9  ;;  %2201 = vmatprep.mubr.msk.bf16.mxu1 %vm2357_vm0, %v2356_v3 }
0x116e   :  { %2199 = vmatprep.subr.bf16.mxu1 %v2356_v3 }
0x1171   :  { %2200 = vmatpush3.bf16.msra.mxu1 %v1584_v13 }
0x1172   :  { %2205 = vmatprep.subr.bf16.mxu1 %v2356_v3 }
0x1178   :  { %2202 = vmatmul.mubr.msk.bf16.vlgmr.msra.gmra.mrb[32].mxu1 %vm108_vm1, %v1588_v22 }
0x1179   :  { %2206 = vmatpush3.bf16.msra.mxu1 %v1633_v21  ;;  %2209 = vmatprep.mubr.msk.bf16.mxu1 %vm2357_vm0, %v2356_v3 }
0x117a   :  { %2207 = vmatprep.subr.bf16.mxu1 %v2356_v3 }
0x117d   :  { %2208 = vmatpush3.bf16.msra.mxu1 %v1634_v7 }
0x117e   :  { %2213 = vmatprep.subr.bf16.mxu1 %v2356_v3 }
0x1184   :  { %2210 = vmatmul.mubr.msk.bf16.vlgmr.msra.gmra.mrb[32].mxu1 %vm108_vm1, %v1638_v32 }
0x1185   :  { %2214 = vmatpush3.bf16.msra.mxu1 %v1683_v31  ;;  %2217 = vmatprep.mubr.msk.bf16.mxu1 %vm2357_vm0, %v2356_v3 }
0x1186   :  { %2215 = vmatprep.subr.bf16.mxu1 %v2356_v3 }
0x1189   :  { %2216 = vmatpush3.bf16.msra.mxu1 %v1684_v35 }
0x118a   :  { %2221 = vmatprep.subr.bf16.mxu1 %v2356_v3 }
0x1190   :  { %2218 = vmatmul.mubr.msk.bf16.vlgmr.msra.gmra.mrb[32].mxu1 %vm108_vm1, %v1688_v28 }
0x1191   :  { %2222 = vmatpush3.bf16.msra.mxu1 %v1733_v40  ;;  %2225 = vmatprep.mubr.msk.bf16.mxu1 %vm2357_vm0, %v2356_v3 }
0x1192   :  { %2223 = vmatprep.subr.bf16.mxu1 %v2356_v3 }
0x1195   :  { %2224 = vmatpush3.bf16.msra.mxu1 %v1734_v43 }
0x1196   :  { %2229 = vmatprep.subr.bf16.mxu1 %v2356_v3 }
0x119c   :  { %2226 = vmatmul.mubr.msk.bf16.vlgmr.msra.gmra.mrb[32].mxu1 %vm108_vm1, %v1738_v49 }
0x119d   :  { %2230 = vmatpush3.bf16.msra.mxu1 %v1783_v48  ;;  %2233 = vmatprep.mubr.msk.bf16.mxu1 %vm2357_vm0, %v2356_v3 }
0x119e   :  { %2231 = vmatprep.subr.bf16.mxu1 %v2356_v3 }
0x11a1   :  { %2232 = vmatpush3.bf16.msra.mxu1 %v1784_v18 }
0x11a2   :  { %2237 = vmatprep.subr.bf16.mxu1 %v2356_v3 }
0x11a8   :  { %2234 = vmatmul.mubr.msk.bf16.vlgmr.msra.gmra.mrb[32].mxu1 %vm108_vm1, %v1788_v55 }
0x11a9   :  { %2238 = vmatpush3.bf16.msra.mxu1 %v1833_v54  ;;  %2241 = vmatprep.mubr.msk.bf16.mxu1 %vm2357_vm0, %v2356_v3 }
0x11aa   :  { %2239 = vmatprep.subr.bf16.mxu1 %v2356_v3 }
0x11ad   :  { %2240 = vmatpush3.bf16.msra.mxu1 %v1834_v58 }
0x11b4   :  { %2242 = vmatmul.mubr.msk.bf16.vlgmr.msra.gmra.mrb[32].mxu1 %vm108_vm1, %v1838_v59 }
0x1287   :  { %v1876_v61 = vpop.f32.mrb[32].mxu1 }
0x1288   :  { %v2245_v62 = vadd.f32 %v1948_v60, %v1876_v61  ;;  %v2243_v63 = vpop.f32.mrb[33].mxu1 }
0x1289   :  { %v1879_v1 = vpop.f32.mrb[34].mxu1 }
0x128a   :  { %v2244_v2 = vpop.f32.mrb[35].mxu1  ;;  %v1884_v4 = vsel %vm1883_vm6, %v2245_v62, -inf }
0x128b   :  { %1885 = vmax.xlane.f32.xlu1 %v1884_v4 }
0x1318   :  { %v1886_v3 = vpop.xlane.xlu1 %1885 }
0x1319   :  { %v1887_v5 = vsub.f32 %v2245_v62, %v1886_v3 }
0x131b   :  { %v1888_v6 = vmul.f32 1.442695, %v1887_v5 }
0x131d   :  { %2328 = vpow2.f32 %v1888_v6 }
0x1327   :  { %v2329_v0 = vpop.eup %2328 }
0x1328   :  { %v1890_v9 = vsel %vm1883_vm6, %v2329_v0, 0.0 }
0x1329   :  { %1891 = vadd.xlane.f32.xlu0 %v1890_v9 }
0x13b6   :  { %v1892_v10 = vpop.xlane.xlu0 %1891 }
0x13b7   :  { %2330 = vlog2.f32 %v1892_v10 }
0x13c1   :  { %v2331_v11 = vpop.eup %2330 }
0x13c2   :  { %v1894_v12 = vmul.f32 0.6931472, %v2331_v11 }
0x13c4   :  { %v1895_v13 = vsub.f32 %v1887_v5, %v1894_v12 }
0x13c6   :  { %1896 = vst.msk [vmem:[#allocation2] sm:$0x3] %vm1883_vm6, %v1895_v13 }
0x13c7   :  { %2343 = shalt.err (!%p2340_p4)
}
0x13c8   :  { %s2344_s4 = scalar_lea.hbm %s2943_s15, 32 }
0x13c9   :  { %p2345_p5 = scmp.ne.s32.totalorder %s2943_s15, %s2344_s4  ;;  %p2348_p6 = scmp.lt.u32.totalorder %s2344_s4, %s2943_s15 }
0x13cb   :  { %p2350_p7 = pnand %p2348_p6, %p2345_p5 }
0x13cd   :  { %2353 = shalt.err (!%p2350_p7)
}
0x13ce   :  { %1906 = dma.vmem_to_hbm [thread:$0]  %s1904_s14, 32, %s2943_s15, [#allocation3]  }
0x13cf   :  { %2354 = dma.done.wait [#allocation3], 32  }
0x13d0   :  { %2355 = vsyncadd [#allocation3], 4294967264 }
0x13d1   :  { %1910 = vsyncpa [#allocation3], 1 }

</bundles_post_ra>
